<compile_context>
chip_gen: v7x
topology: tpu7x:2x2x1
jax: 0.10.0
libtpu: 0.0.40
codegen_flags: <defaults>
</compile_context>

<pallas_src>
import functools

import jax
import jax.numpy as jnp
from jax.experimental import pallas as pl
from jax.experimental.pallas import tpu as pltpu


_VMEM_LIMIT = 64 * 1024 * 1024        # scoped-VMEM cap (<= physical on all gens)
_CONV_VMEM_BUDGET = 28 * 1024 * 1024  # working-set target for conv row-tile sizing
_POOL_VMEM_BUDGET = 4 * 1024 * 1024


# ----------------------------------------------------------------------------
# helpers
# ----------------------------------------------------------------------------
def _round_up(x, m):
    return (x + m - 1) // m * m


def _pick_tile(dim, candidates):
    """Largest candidate that divides `dim`, else the full dim."""
    for c in candidates:
        if c <= dim and dim % c == 0:
            return c
    return dim


def _to_nchw(x):
    return jnp.transpose(x, (0, 3, 1, 2))


# ----------------------------------------------------------------------------
# Pallas kernels
# ----------------------------------------------------------------------------
def _conv3x3_tap_kernel(x_ref, w_ref, b_ref, o_ref, *, wp, apply_relu):
    """Row-block of a reflect-padded 3x3 conv as 9 offset-slid MXU matmuls.

    x_ref: (1, (tr+3)*wp, Cin) bf16  halo'd, spatially-flattened row block
    w_ref: (9, Cin, tn)        bf16  per-tap weight slabs (t = kh*3 + kw)
    b_ref: (1, tn)             f32
    o_ref: (1, tr*wp, tn)            padded-width output (last 2 cols junk)
    """
    m_blk = o_ref.shape[1]
    acc = None
    for t in range(9):                               # static unroll: 9 matmuls
        kh, kw = divmod(t, 3)
        lhs = x_ref[0, pl.ds(kh * wp + kw, m_blk), :]
        contrib = jnp.dot(lhs, w_ref[t], preferred_element_type=jnp.float32)
        acc = contrib if acc is None else acc + contrib
    acc = acc + b_ref[...]
    if apply_relu:
        acc = jnp.maximum(acc, 0.0)
    o_ref[0] = acc.astype(o_ref.dtype)               # single epilogue store


def _matmul_bias_kernel(a_ref, w_ref, b_ref, o_ref, *, apply_relu):
    """o = [relu](A @ W + b), M-tiled (used by the im2col Cin=3 first conv)."""
    acc = jnp.dot(a_ref[...], w_ref[...], preferred_element_type=jnp.float32)
    acc = acc + b_ref[...]
    if apply_relu:
        acc = jnp.maximum(acc, 0.0)
    o_ref[...] = acc.astype(o_ref.dtype)


def _maxpool_kernel(x_ref, o_ref, *, c):
    """2x2/2 max pool over R output rows.  x_ref: (R, 2, w2, 2c) -> (R, w2, c)."""
    v = x_ref[...]
    r = jnp.maximum(v[:, 0], v[:, 1])                 # max over the two rows
    o_ref[...] = jnp.maximum(r[..., :c], r[..., c:])  # max over the two cols


# ----------------------------------------------------------------------------
# Pallas wrappers
# ----------------------------------------------------------------------------
def _conv_row_tile(h, wp, cin, tn, out_itemsize, budget=_CONV_VMEM_BUDGET):
    """Largest row tile (divisor of h) whose estimated VMEM fits the budget."""
    lane_cin = _round_up(cin, 128)
    lane_tn = _round_up(tn, 128)

    def est(tr):
        rows_in = (tr + 3) * wp
        m_blk = tr * wp
        in_b = 2 * rows_in * lane_cin * 2             # bf16, double-buffered
        w_b = 2 * 9 * cin * lane_tn * 2               # bf16, double-buffered
        out_b = 2 * m_blk * lane_tn * out_itemsize    # double-buffered
        acc_b = 2 * m_blk * lane_tn * 4               # f32 accumulator temps
        return in_b + w_b + out_b + acc_b

    cands = [c for c in (h, 256, 128, 96, 64, 48, 32, 24, 16, 12, 8, 6, 4, 3, 2, 1)
             if 0 < c <= h and h % c == 0]
    for tr in cands:
        if est(tr) <= budget:
            return tr
    return cands[-1]


def conv3x3_reflect(x, w_taps, bias, apply_relu=True, out_dtype=jnp.float32,
                    row_tile=None):
    """ReflectionPad2d(1) + Conv2d(k=3, s=1) [+ ReLU], NHWC in/out.

    x:      (N, H, W, Cin)
    w_taps: (9, Cin, Cout) bf16   (tap index t = kh*3 + kw)
    bias:   (1, Cout)      f32
    """
    n, h, w, cin = x.shape
    cout = w_taps.shape[-1]
    wp = w + 2
    out_itemsize = jnp.dtype(out_dtype).itemsize

    tn = _pick_tile(cout, (256, 128))
    n_j = cout // tn
    tr = row_tile if row_tile is not None else _conv_row_tile(
        h, wp, cin, tn, out_itemsize)
    assert h % tr == 0, (h, tr)
    n_rb = h // tr
    rows_in = (tr + 3) * wp
    m_blk = tr * wp

    # Reflect-pad (+1 zero guard row for the flattened-window overrun), then
    # lay out halo'd row blocks contiguously in HBM (replaces v2's padded copy).
    xb = x.astype(jnp.bfloat16)
    xp = jnp.pad(xb, ((0, 0), (1, 1), (1, 1), (0, 0)), mode="reflect")
    xp = jnp.pad(xp, ((0, 0), (0, 1), (0, 0), (0, 0)))        # guard row -> H+3
    if n_rb == 1:
        xf = xp.reshape(n, rows_in, cin)
    else:
        blocks = [xp[:, rb * tr: rb * tr + tr + 3] for rb in range(n_rb)]
        xf = jnp.stack(blocks, axis=1).reshape(n * n_rb, rows_in, cin)

    kern = functools.partial(_conv3x3_tap_kernel, wp=wp, apply_relu=apply_relu)
    out = pl.pallas_call(
        kern,
        out_shape=jax.ShapeDtypeStruct((n * n_rb, m_blk, cout), out_dtype),
        grid=(n_j, n * n_rb),                    # row-block axis innermost:
        in_specs=[                               # weight slab stays VMEM-resident
            pl.BlockSpec((1, rows_in, cin), lambda j, i: (i, 0, 0)),
            pl.BlockSpec((9, cin, tn), lambda j, i: (0, 0, j)),
            pl.BlockSpec((1, tn), lambda j, i: (0, j)),
        ],
        out_specs=pl.BlockSpec((1, m_blk, tn), lambda j, i: (i, 0, j)),
        compiler_params=pltpu.CompilerParams(
            dimension_semantics=("parallel", "parallel"),
            vmem_limit_bytes=_VMEM_LIMIT),
        cost_estimate=pl.CostEstimate(
            flops=2 * n * h * wp * 9 * cin * cout,
            transcendentals=0,
            bytes_accessed=(n * n_rb * rows_in * cin * 2 * n_j
                            + 9 * cin * cout * 2 * n_j
                            + n * h * wp * cout * out_itemsize)),
    )(xf, w_taps, bias)
    # drop the 2 junk columns per row (fuses with the next layer's pad / pool)
    return out.reshape(n, h, wp, cout)[:, :, :w, :]


def conv3x3_reflect_small_cin(x, w_taps, bias, apply_relu=True,
                              out_dtype=jnp.float32):
    """Reflect-pad 3x3 conv for tiny Cin (the folded 3->64 first layer).

    Uses a K = 9*Cin im2col and one MXU matmul per M tile, so the 3-channel
    activation never becomes a (rows, 3) VMEM block and the MXU never sees K=3.
    """
    n, h, w, cin = x.shape
    cout = w_taps.shape[-1]
    k = 9 * cin
    xp = jnp.pad(x.astype(jnp.bfloat16), ((0, 0), (1, 1), (1, 1), (0, 0)),
                 mode="reflect")
    cols = [xp[:, kh:kh + h, kw:kw + w, :] for kh in range(3) for kw in range(3)]
    a = jnp.concatenate(cols, axis=-1).reshape(n * h * w, k)
    wk = w_taps.reshape(k, cout).astype(jnp.bfloat16)

    m = n * h * w
    tm = _pick_tile(m, (1024, 512, 256, 128, 64, 32, 16, 8))
    out_itemsize = jnp.dtype(out_dtype).itemsize
    kern = functools.partial(_matmul_bias_kernel, apply_relu=apply_relu)
    out = pl.pallas_call(
        kern,
        out_shape=jax.ShapeDtypeStruct((m, cout), out_dtype),
        grid=(m // tm,),
        in_specs=[
            pl.BlockSpec((tm, k), lambda i: (i, 0)),
            pl.BlockSpec((k, cout), lambda i: (0, 0)),
            pl.BlockSpec((1, cout), lambda i: (0, 0)),
        ],
        out_specs=pl.BlockSpec((tm, cout), lambda i: (i, 0)),
        compiler_params=pltpu.CompilerParams(
            dimension_semantics=("parallel",),
            vmem_limit_bytes=_VMEM_LIMIT),
        cost_estimate=pl.CostEstimate(
            flops=2 * m * k * cout, transcendentals=0,
            bytes_accessed=m * k * 2 + k * cout * 2 + m * cout * out_itemsize),
    )(a, wk, bias)
    return out.reshape(n, h, w, cout)


def maxpool2x2(x):
    """MaxPool2d(2, 2), NHWC.  Many output rows per grid step."""
    n, h, w, c = x.shape
    assert h % 2 == 0 and w % 2 == 0, "MaxPool2d(2,2) needs even H and W"
    h2, w2 = h // 2, w // 2
    itemsize = jnp.dtype(x.dtype).itemsize
    lane_2c = _round_up(2 * c, 128)

    rows = 1
    for cand in (h2, 64, 32, 16, 8, 4, 2, 1):
        if cand <= h2 and h2 % cand == 0:
            if 2 * cand * 2 * w2 * lane_2c * itemsize <= _POOL_VMEM_BUDGET:
                rows = cand
                break

    xr = x.reshape(n * h2, 2, w2, 2 * c)                      # free reshape
    kern = functools.partial(_maxpool_kernel, c=c)
    out = pl.pallas_call(
        kern,
        out_shape=jax.ShapeDtypeStruct((n * h2, w2, c), x.dtype),
        grid=((n * h2) // rows,),
        in_specs=[pl.BlockSpec((rows, 2, w2, 2 * c), lambda i: (i, 0, 0, 0))],
        out_specs=pl.BlockSpec((rows, w2, c), lambda i: (i, 0, 0)),
        compiler_params=pltpu.CompilerParams(
            dimension_semantics=("parallel",),
            vmem_limit_bytes=_VMEM_LIMIT),
    )(xr)
    return out.reshape(n, h2, w2, c)


# ----------------------------------------------------------------------------
# Network definition (matches make_vgg / NormalizedVGG slicing)
# ----------------------------------------------------------------------------
_CONV_CFG = [
    (3, 3, 1),      # 0: Conv2d(3,3,1)   (1x1 RGB remix, no ReLU; folded at prep)
    (3, 64, 3),     # 1: conv1_1 -> relu1_1
    (64, 64, 3),    # 2: conv1_2
    (64, 128, 3),   # 3: conv2_1 -> relu2_1
    (128, 128, 3),  # 4: conv2_2
    (128, 256, 3),  # 5: conv3_1 -> relu3_1
    (256, 256, 3),  # 6
    (256, 256, 3),  # 7
    (256, 256, 3),  # 8
    (256, 512, 3),  # 9: conv4_1 -> relu4_1
    (512, 512, 3),  # 10
    (512, 512, 3),  # 11
    (512, 512, 3),  # 12
    (512, 512, 3),  # 13: conv5_1 -> relu5_1
]


def init_params(key):
    """Deterministic synthetic weights (He-style scale), PyTorch OIHW layout."""
    # TODO(synk): the reference loads models/vgg_normalised.pth; synthetic init here.
    params = []
    for cin, cout, k in _CONV_CFG:
        key, kw_key, kb_key = jax.random.split(key, 3)
        scale = (2.0 / (cin * k * k)) ** 0.5
        w = jax.random.normal(kw_key, (cout, cin, k, k), jnp.float32) * scale
        b = jax.random.normal(kb_key, (cout,), jnp.float32) * 0.01
        params.append((w, b))
    return params


def prepare_params(params):
    """One-time weight prep: fold the 1x1 conv into conv1_1, bf16 tap layouts."""
    w0, b0 = params[0]                        # (3,3,1,1), (3,)
    w1, b1 = params[1]                        # (64,3,3,3), (64,)
    w0m = w0[:, :, 0, 0]                      # (cout0=3, cin0=3)
    # Exact fold (no ReLU between layer 0 and layer 1):
    #   W'[o, j, y, x] = sum_i W1[o, i, y, x] * W0[i, j]
    #   b'[o]          = b1[o] + sum_{y,x,i} W1[o, i, y, x] * b0[i]
    wf = jnp.einsum("oiyx,ij->ojyx", w1, w0m)
    bf = b1 + jnp.einsum("oiyx,i->o", w1, b0)
    folded = [(wf, bf)] + list(params[2:])

    prepped = []
    for w, b in folded:
        cout, cin = w.shape[:2]
        wm = jnp.transpose(w, (2, 3, 1, 0)).reshape(9, cin, cout)   # (9,Cin,Cout)
        prepped.append((wm.astype(jnp.bfloat16),
                        b.reshape(1, cout).astype(jnp.float32)))
    return prepped


def normalized_vgg_forward(x_nchw, params, layer=None):
    """Forward of NormalizedVGG.  x_nchw: (N,3,H,W) f32; params: prepare_params()."""
    x = jnp.transpose(x_nchw, (0, 2, 3, 1)).astype(jnp.float32)     # -> NHWC

    # slice1: [Conv(3,3,1) folded in] RefPad Conv(3,64,3) ReLU
    relu1 = conv3x3_reflect_small_cin(x, *params[0], apply_relu=True)
    if layer == 1:
        return _to_nchw(relu1)

    # slice2: RefPad Conv(64,64) ReLU, MaxPool, RefPad Conv(64,128) ReLU
    h = conv3x3_reflect(relu1, *params[1], out_dtype=jnp.bfloat16)
    h = maxpool2x2(h)
    relu2 = conv3x3_reflect(h, *params[2])
    if layer == 2:
        return _to_nchw(relu2)

    # slice3: RefPad Conv(128,128) ReLU, MaxPool, RefPad Conv(128,256) ReLU
    h = conv3x3_reflect(relu2, *params[3], out_dtype=jnp.bfloat16)
    h = maxpool2x2(h)
    relu3 = conv3x3_reflect(h, *params[4])
    if layer == 3:
        return _to_nchw(relu3)

    # slice4: 3x [RefPad Conv(256,256) ReLU], MaxPool, RefPad Conv(256,512) ReLU
    h = relu3
    for i in (5, 6, 7):
        h = conv3x3_reflect(h, *params[i], out_dtype=jnp.bfloat16)
    h = maxpool2x2(h)
    relu4 = conv3x3_reflect(h, *params[8])
    if layer == 4:
        return _to_nchw(relu4)

    # slice5: 3x [RefPad Conv(512,512) ReLU], MaxPool, RefPad Conv(512,512) ReLU
    h = relu4
    for i in (9, 10, 11):
        h = conv3x3_reflect(h, *params[i], out_dtype=jnp.bfloat16)
    h = maxpool2x2(h)
    relu5 = conv3x3_reflect(h, *params[12])
    if layer == 5:
        return _to_nchw(relu5)

    return [_to_nchw(o) for o in (relu1, relu2, relu3, relu4, relu5)]


# ----------------------------------------------------------------------------
# Reference (pure JAX) for unit checks
# ----------------------------------------------------------------------------
def _ref_conv3x3_reflect(x, w_oihw, b, relu=True):
    xp = jnp.pad(x, ((0, 0), (1, 1), (1, 1), (0, 0)), mode="reflect")
    y = jax.lax.conv_general_dilated(
        xp, w_oihw, window_strides=(1, 1), padding="VALID",
        dimension_numbers=("NHWC", "OIHW", "NHWC"))
    y = y + b.reshape(1, 1, 1, -1)
    return jnp.maximum(y, 0.0) if relu else y


# ----------------------------------------------------------------------------
# Demo
# ----------------------------------------------------------------------------
if __name__ == "__main__":
    key = jax.random.PRNGKey(0)
    kx, kp, k1, k2, k3, k4 = jax.random.split(key, 6)

    # --- unit check: row-tiled halo conv (forces n_rb > 1) vs lax reference ---
    xt = jax.random.normal(k1, (2, 16, 16, 64), jnp.float32)
    wt = jax.random.normal(k2, (64, 64, 3, 3), jnp.float32) * 0.05
    bt = jax.random.normal(k3, (64,), jnp.float32) * 0.1
    wtaps = jnp.transpose(wt, (2, 3, 1, 0)).reshape(9, 64, 64).astype(jnp.bfloat16)
    got = conv3x3_reflect(xt, wtaps, bt.reshape(1, 64), apply_relu=True, row_tile=4)
    ref = _ref_conv3x3_reflect(xt, wt, bt, relu=True)
    got = jax.block_until_ready(got)
    err = float(jnp.max(jnp.abs(got.astype(jnp.float32) - ref)))
    scale = float(jnp.max(jnp.abs(ref)))
    assert err <= 0.05 * (scale + 1.0), f"halo conv mismatch: err={err} scale={scale}"

    # --- unit check: small-Cin im2col conv vs lax reference -------------------
    xs = jax.random.normal(k4, (2, 8, 8, 3), jnp.float32)
    wts = jax.random.normal(k2, (64, 3, 3, 3), jnp.float32) * 0.2
    wtaps_s = jnp.transpose(wts, (2, 3, 1, 0)).reshape(9, 3, 64).astype(jnp.bfloat16)
    got_s = conv3x3_reflect_small_cin(xs, wtaps_s, bt.reshape(1, 64), apply_relu=True)
    ref_s = _ref_conv3x3_reflect(xs, wts, bt, relu=True)
    err_s = float(jnp.max(jnp.abs(got_s.astype(jnp.float32) - ref_s)))
    scale_s = float(jnp.max(jnp.abs(ref_s)))
    assert err_s <= 0.05 * (scale_s + 1.0), f"cin=3 conv mismatch: err={err_s}"

    # --- full NormalizedVGG forward -------------------------------------------
    # Spatial 32 so the deepest ReflectionPad2d(1) (applied at 2x2) is valid,
    # exactly as PyTorch would require.
    x = jax.random.normal(kx, (2, 3, 32, 32), jnp.float32)     # NCHW input
    params = prepare_params(init_params(kp))

    fwd = jax.jit(normalized_vgg_forward, static_argnames=("layer",))
    outs = fwd(x, params)
    outs = [jax.block_until_ready(o) for o in outs]

    expected = [(2, 64, 32, 32), (2, 128, 16, 16), (2, 256, 8, 8),
                (2, 512, 4, 4), (2, 512, 2, 2)]
    got_shapes = [tuple(o.shape) for o in outs]
    assert got_shapes == expected, f"shape mismatch: {got_shapes} vs {expected}"
    assert all(bool(jnp.all(jnp.isfinite(o))) for o in outs)

    print("KERNEL_OK")
</pallas_src>

<mosaic_0001>
module attributes {stable_mosaic.version = 11 : i64} {
  func.func @_conv3x3_tap_kernel(%arg0: i32, %arg1: i32, %arg2: memref<1x126x64xbf16, #tpu.memory_space<vmem>>, %arg3: memref<9x64x64xbf16, #tpu.memory_space<vmem>>, %arg4: memref<1x64xf32, #tpu.memory_space<vmem>>, %arg5: memref<1x72x64xf32, #tpu.memory_space<vmem>>) attributes {dimension_semantics = [#tpu.dimension_semantics<parallel>, #tpu.dimension_semantics<parallel>], iteration_bounds = array<i64: 1, 8>, scalar_prefetch = 0 : i64, scratch_operands = 0 : i64, tpu.core_type = #tpu.core_type<tc>, window_params = [{transform_indices = @transform_0, window_bounds = array<i64: 1, 126, 64>}, {transform_indices = @transform_1, window_bounds = array<i64: 9, 64, 64>}, {transform_indices = @transform_2, window_bounds = array<i64: 1, 64>}, {transform_indices = @transform_3, window_bounds = array<i64: 1, 72, 64>}]} {
    %c0 = arith.constant 0 : index
    %c0_0 = arith.constant 0 : index
    %c0_1 = arith.constant 0 : index
    %0 = vector.load %arg2[%c0, %c0_0, %c0_1] : memref<1x126x64xbf16, #tpu.memory_space<vmem>>, vector<1x72x64xbf16>
    %1 = vector.shape_cast %0 : vector<1x72x64xbf16> to vector<72x64xbf16>
    %c0_2 = arith.constant 0 : index
    %c0_3 = arith.constant 0 : index
    %c0_4 = arith.constant 0 : index
    %2 = vector.load %arg3[%c0_2, %c0_3, %c0_4] : memref<9x64x64xbf16, #tpu.memory_space<vmem>>, vector<1x64x64xbf16>
    %3 = vector.shape_cast %2 : vector<1x64x64xbf16> to vector<64x64xbf16>
    %cst = arith.constant dense<0.000000e+00> : vector<72x64xf32>
    %4 = tpu.matmul %1, %3, %cst {dimension_numbers = #tpu.dot_dimension_numbers<[1], [0], [0], [1], [0, 0, 1, 1], [], []>} : vector<72x64xbf16>, vector<64x64xbf16>, vector<72x64xf32> -> vector<72x64xf32>
    %c0_5 = arith.constant 0 : index
    %c1 = arith.constant 1 : index
    %c0_6 = arith.constant 0 : index
    %5 = vector.load %arg2[%c0_5, %c1, %c0_6] : memref<1x126x64xbf16, #tpu.memory_space<vmem>>, vector<1x72x64xbf16>
    %6 = vector.shape_cast %5 : vector<1x72x64xbf16> to vector<72x64xbf16>
    %c1_7 = arith.constant 1 : index
    %c0_8 = arith.constant 0 : index
    %c0_9 = arith.constant 0 : index
    %7 = vector.load %arg3[%c1_7, %c0_8, %c0_9] : memref<9x64x64xbf16, #tpu.memory_space<vmem>>, vector<1x64x64xbf16>
    %8 = vector.shape_cast %7 : vector<1x64x64xbf16> to vector<64x64xbf16>
    %cst_10 = arith.constant dense<0.000000e+00> : vector<72x64xf32>
    %9 = tpu.matmul %6, %8, %cst_10 {dimension_numbers = #tpu.dot_dimension_numbers<[1], [0], [0], [1], [0, 0, 1, 1], [], []>} : vector<72x64xbf16>, vector<64x64xbf16>, vector<72x64xf32> -> vector<72x64xf32>
    %10 = arith.addf %4, %9 : vector<72x64xf32>
    %c0_11 = arith.constant 0 : index
    %c2 = arith.constant 2 : index
    %c0_12 = arith.constant 0 : index
    %11 = vector.load %arg2[%c0_11, %c2, %c0_12] : memref<1x126x64xbf16, #tpu.memory_space<vmem>>, vector<1x72x64xbf16>
    %12 = vector.shape_cast %11 : vector<1x72x64xbf16> to vector<72x64xbf16>
    %c2_13 = arith.constant 2 : index
    %c0_14 = arith.constant 0 : index
    %c0_15 = arith.constant 0 : index
    %13 = vector.load %arg3[%c2_13, %c0_14, %c0_15] : memref<9x64x64xbf16, #tpu.memory_space<vmem>>, vector<1x64x64xbf16>
    %14 = vector.shape_cast %13 : vector<1x64x64xbf16> to vector<64x64xbf16>
    %cst_16 = arith.constant dense<0.000000e+00> : vector<72x64xf32>
    %15 = tpu.matmul %12, %14, %cst_16 {dimension_numbers = #tpu.dot_dimension_numbers<[1], [0], [0], [1], [0, 0, 1, 1], [], []>} : vector<72x64xbf16>, vector<64x64xbf16>, vector<72x64xf32> -> vector<72x64xf32>
    %16 = arith.addf %10, %15 : vector<72x64xf32>
    %c0_17 = arith.constant 0 : index
    %c18 = arith.constant 18 : index
    %c0_18 = arith.constant 0 : index
    %17 = vector.load %arg2[%c0_17, %c18, %c0_18] : memref<1x126x64xbf16, #tpu.memory_space<vmem>>, vector<1x72x64xbf16>
    %18 = vector.shape_cast %17 : vector<1x72x64xbf16> to vector<72x64xbf16>
    %c3 = arith.constant 3 : index
    %c0_19 = arith.constant 0 : index
    %c0_20 = arith.constant 0 : index
    %19 = vector.load %arg3[%c3, %c0_19, %c0_20] : memref<9x64x64xbf16, #tpu.memory_space<vmem>>, vector<1x64x64xbf16>
    %20 = vector.shape_cast %19 : vector<1x64x64xbf16> to vector<64x64xbf16>
    %cst_21 = arith.constant dense<0.000000e+00> : vector<72x64xf32>
    %21 = tpu.matmul %18, %20, %cst_21 {dimension_numbers = #tpu.dot_dimension_numbers<[1], [0], [0], [1], [0, 0, 1, 1], [], []>} : vector<72x64xbf16>, vector<64x64xbf16>, vector<72x64xf32> -> vector<72x64xf32>
    %22 = arith.addf %16, %21 : vector<72x64xf32>
    %c0_22 = arith.constant 0 : index
    %c19 = arith.constant 19 : index
    %c0_23 = arith.constant 0 : index
    %23 = vector.load %arg2[%c0_22, %c19, %c0_23] : memref<1x126x64xbf16, #tpu.memory_space<vmem>>, vector<1x72x64xbf16>
    %24 = vector.shape_cast %23 : vector<1x72x64xbf16> to vector<72x64xbf16>
    %c4 = arith.constant 4 : index
    %c0_24 = arith.constant 0 : index
    %c0_25 = arith.constant 0 : index
    %25 = vector.load %arg3[%c4, %c0_24, %c0_25] : memref<9x64x64xbf16, #tpu.memory_space<vmem>>, vector<1x64x64xbf16>
    %26 = vector.shape_cast %25 : vector<1x64x64xbf16> to vector<64x64xbf16>
    %cst_26 = arith.constant dense<0.000000e+00> : vector<72x64xf32>
    %27 = tpu.matmul %24, %26, %cst_26 {dimension_numbers = #tpu.dot_dimension_numbers<[1], [0], [0], [1], [0, 0, 1, 1], [], []>} : vector<72x64xbf16>, vector<64x64xbf16>, vector<72x64xf32> -> vector<72x64xf32>
    %28 = arith.addf %22, %27 : vector<72x64xf32>
    %c0_27 = arith.constant 0 : index
    %c20 = arith.constant 20 : index
    %c0_28 = arith.constant 0 : index
    %29 = vector.load %arg2[%c0_27, %c20, %c0_28] : memref<1x126x64xbf16, #tpu.memory_space<vmem>>, vector<1x72x64xbf16>
    %30 = vector.shape_cast %29 : vector<1x72x64xbf16> to vector<72x64xbf16>
    %c5 = arith.constant 5 : index
    %c0_29 = arith.constant 0 : index
    %c0_30 = arith.constant 0 : index
    %31 = vector.load %arg3[%c5, %c0_29, %c0_30] : memref<9x64x64xbf16, #tpu.memory_space<vmem>>, vector<1x64x64xbf16>
    %32 = vector.shape_cast %31 : vector<1x64x64xbf16> to vector<64x64xbf16>
    %cst_31 = arith.constant dense<0.000000e+00> : vector<72x64xf32>
    %33 = tpu.matmul %30, %32, %cst_31 {dimension_numbers = #tpu.dot_dimension_numbers<[1], [0], [0], [1], [0, 0, 1, 1], [], []>} : vector<72x64xbf16>, vector<64x64xbf16>, vector<72x64xf32> -> vector<72x64xf32>
    %34 = arith.addf %28, %33 : vector<72x64xf32>
    %c0_32 = arith.constant 0 : index
    %c36 = arith.constant 36 : index
    %c0_33 = arith.constant 0 : index
    %35 = vector.load %arg2[%c0_32, %c36, %c0_33] : memref<1x126x64xbf16, #tpu.memory_space<vmem>>, vector<1x72x64xbf16>
    %36 = vector.shape_cast %35 : vector<1x72x64xbf16> to vector<72x64xbf16>
    %c6 = arith.constant 6 : index
    %c0_34 = arith.constant 0 : index
    %c0_35 = arith.constant 0 : index
    %37 = vector.load %arg3[%c6, %c0_34, %c0_35] : memref<9x64x64xbf16, #tpu.memory_space<vmem>>, vector<1x64x64xbf16>
    %38 = vector.shape_cast %37 : vector<1x64x64xbf16> to vector<64x64xbf16>
    %cst_36 = arith.constant dense<0.000000e+00> : vector<72x64xf32>
    %39 = tpu.matmul %36, %38, %cst_36 {dimension_numbers = #tpu.dot_dimension_numbers<[1], [0], [0], [1], [0, 0, 1, 1], [], []>} : vector<72x64xbf16>, vector<64x64xbf16>, vector<72x64xf32> -> vector<72x64xf32>
    %40 = arith.addf %34, %39 : vector<72x64xf32>
    %c0_37 = arith.constant 0 : index
    %c37 = arith.constant 37 : index
    %c0_38 = arith.constant 0 : index
    %41 = vector.load %arg2[%c0_37, %c37, %c0_38] : memref<1x126x64xbf16, #tpu.memory_space<vmem>>, vector<1x72x64xbf16>
    %42 = vector.shape_cast %41 : vector<1x72x64xbf16> to vector<72x64xbf16>
    %c7 = arith.constant 7 : index
    %c0_39 = arith.constant 0 : index
    %c0_40 = arith.constant 0 : index
    %43 = vector.load %arg3[%c7, %c0_39, %c0_40] : memref<9x64x64xbf16, #tpu.memory_space<vmem>>, vector<1x64x64xbf16>
    %44 = vector.shape_cast %43 : vector<1x64x64xbf16> to vector<64x64xbf16>
    %cst_41 = arith.constant dense<0.000000e+00> : vector<72x64xf32>
    %45 = tpu.matmul %42, %44, %cst_41 {dimension_numbers = #tpu.dot_dimension_numbers<[1], [0], [0], [1], [0, 0, 1, 1], [], []>} : vector<72x64xbf16>, vector<64x64xbf16>, vector<72x64xf32> -> vector<72x64xf32>
    %46 = arith.addf %40, %45 : vector<72x64xf32>
    %c0_42 = arith.constant 0 : index
    %c38 = arith.constant 38 : index
    %c0_43 = arith.constant 0 : index
    %47 = vector.load %arg2[%c0_42, %c38, %c0_43] : memref<1x126x64xbf16, #tpu.memory_space<vmem>>, vector<1x72x64xbf16>
    %48 = vector.shape_cast %47 : vector<1x72x64xbf16> to vector<72x64xbf16>
    %c8 = arith.constant 8 : index
    %c0_44 = arith.constant 0 : index
    %c0_45 = arith.constant 0 : index
    %49 = vector.load %arg3[%c8, %c0_44, %c0_45] : memref<9x64x64xbf16, #tpu.memory_space<vmem>>, vector<1x64x64xbf16>
    %50 = vector.shape_cast %49 : vector<1x64x64xbf16> to vector<64x64xbf16>
    %cst_46 = arith.constant dense<0.000000e+00> : vector<72x64xf32>
    %51 = tpu.matmul %48, %50, %cst_46 {dimension_numbers = #tpu.dot_dimension_numbers<[1], [0], [0], [1], [0, 0, 1, 1], [], []>} : vector<72x64xbf16>, vector<64x64xbf16>, vector<72x64xf32> -> vector<72x64xf32>
    %52 = arith.addf %46, %51 : vector<72x64xf32>
    %c0_47 = arith.constant 0 : index
    %c0_48 = arith.constant 0 : index
    %53 = vector.load %arg4[%c0_47, %c0_48] : memref<1x64xf32, #tpu.memory_space<vmem>>, vector<1x64xf32>
    %54 = vector.broadcast %53 : vector<1x64xf32> to vector<72x64xf32>
    %55 = arith.addf %52, %54 : vector<72x64xf32>
    %cst_49 = arith.constant 0.000000e+00 : f32
    %56 = vector.broadcast %cst_49 : f32 to vector<72x64xf32>
    %57 = arith.maximumf %55, %56 : vector<72x64xf32>
    %c0_50 = arith.constant 0 : index
    %c0_51 = arith.constant 0 : index
    %c0_52 = arith.constant 0 : index
    %58 = vector.load %arg5[%c0_50, %c0_51, %c0_52] : memref<1x72x64xf32, #tpu.memory_space<vmem>>, vector<1x72x64xf32>
    %59 = vector.shape_cast %58 : vector<1x72x64xf32> to vector<72x64xf32>
    %60 = vector.shape_cast %57 : vector<72x64xf32> to vector<1x72x64xf32>
    tpu.vector_store %arg5[%c0_50, %c0_51, %c0_52], %60 {strides = array<i32>} : memref<1x72x64xf32, #tpu.memory_space<vmem>>, vector<1x72x64xf32>,
    return
  }
  func.func @transform_0(%arg0: i32, %arg1: i32) -> (i32, i32, i32) {
    %c0_i32 = arith.constant 0 : i32
    %c0_i32_0 = arith.constant 0 : i32
    %c0_i32_1 = arith.constant 0 : i32
    return %arg1, %c0_i32, %c0_i32_0 : i32, i32, i32
  }
  func.func @transform_1(%arg0: i32, %arg1: i32) -> (i32, i32, i32) {
    %c0_i32 = arith.constant 0 : i32
    %c0_i32_0 = arith.constant 0 : i32
    %c0_i32_1 = arith.constant 0 : i32
    return %c0_i32, %c0_i32_0, %arg0 : i32, i32, i32
  }
  func.func @transform_2(%arg0: i32, %arg1: i32) -> (i32, i32) {
    %c0_i32 = arith.constant 0 : i32
    %c0_i32_0 = arith.constant 0 : i32
    return %c0_i32, %arg0 : i32, i32
  }
  func.func @transform_3(%arg0: i32, %arg1: i32) -> (i32, i32, i32) {
    %c0_i32 = arith.constant 0 : i32
    %c0_i32_0 = arith.constant 0 : i32
    return %arg1, %c0_i32, %arg0 : i32, i32, i32
  }
}

</mosaic_0001>

<bundles_post_ra>
// kernel: tpu_custom_call.1
= control target key start
LH: loop header
LB: loop body
LE: loop exit
PB: predicated region body
PF: predicated region fallthrough
CT: control target
= control target key end

     0   :  { %8 = vsyncpa [#allocation3], 0  ;;  %s3290_s0 = inlined_call_operand.hbm [shape: bf16[8,126,64], index: 0, kind: input, shape index: {}]   ;;  %s3291_s1 = inlined_call_operand.hbm [shape: bf16[9,64,64], index: 1, kind: input, shape index: {}]   ;;  %s3292_s2 = inlined_call_operand.hbm [shape: f32[1,64], index: 2, kind: input, shape index: {}]   ;;  %s3293_s3 = inlined_call_operand.hbm [shape: f32[8,72,64], index: 3, kind: output, shape index: {}]  }
   0x1   :  { %10 = vsyncpa [#allocation3 + $0x1], 0 }
   0x2   :  { %11 = vsyncpa [#allocation6], 0 }
   0x3   :  { %12 = vsyncpa [#allocation4], 0 }
   0x4   :  { %14 = vsyncpa [#allocation4 + $0x1], 0  ;;  %s2656_s12 = smov 0   ;;  %s2658_s13 = smov 0  }
   0x5   :  { %s2660_s14 = smov 0   ;;  %s2662_s15 = smov 0  }
   0x6   :  { %s2664_s16 = smov 0   ;;  %s2666_s17 = smov 0  }
   0x7 LB: > { %s1843_s18 = sadd.s32 4294967295, %s2624_s17   ;;  %s1844_s19 = sadd.s32 4294967294, %s2624_s17   ;;  %s2624_s17 = sphi %s2666_s17, %s20_s17   ;;  %s2620_s16 = sphi %s2664_s16, %s3315_s16   ;;  %s2616_s15 = sphi %s2662_s15, %s3314_s15   ;;  %s2612_s14 = sphi %s2660_s14, %s3313_s14   ;;  %s2608_s13 = sphi %s2658_s13, %s3312_s13   ;;  %s2604_s12 = sphi %s2656_s12, %s3311_s12  }
   0x8   : > { %p52_p0 = scmp.ne.s32.totalorder %s2608_s13, %s2604_s12  ;;  %p2690_p1 = scmp.eq.s32.totalorder %s1843_s18, 0 }
   0x9   : > { %p2694_p2 = scmp.eq.s32.totalorder %s1843_s18, 7  ;;  %p136_p3 = scmp.eq.s32.totalorder %s1844_s19, 7 }
   0xa   : > { %s3298_s20 = scalar_select %p2690_p1, 1, 0 }
   0xb   : > { %s3299_s21 = scalar_select %p2694_p2, 1, 0 }
   0xc   : > { %p2700_p4 = por %p2690_p1, %p52_p0  ;;  %p1845_p5 = scmp.ge.s32.totalorder %s2624_s17, 1 }
   0xd   : > { %p2705_p6 = por %p136_p3, %p52_p0  ;;  %p143_p7 = scmp.lt.s32.totalorder %s2624_s17, 9 }
   0xe   : > { %s3300_s22 = scalar_select %p2700_p4, 1, 0 }
   0xf   : > { %s3301_s23 = scalar_select %p2705_p6, 1, 0 }
  0x10   : > { %p2710_p8 = pnand %p1845_p5, %p143_p7  ;;  %s2626_s25 = smov [#allocation5]  }
  0x11   : > { %s157_s26 = sshll.u32 %s2626_s25, 4  ;;  %s2627_s28 = smov [#allocation7]   ;;  %s158_s26 = int_to_ptr.vmem [resolvable:$true] %s157_s26 }
  0x12   : > { %s3302_s24 = scalar_select %p2710_p8, 1, 0 }
  0x13   : > { %p2318_p9 = pneg %p2710_p8  ;;  %s173_s29 = sshll.u32 %s2627_s28, 4  ;;  %s2722_s29 = int_to_ptr.vmem [resolvable:$true] %s173_s29 }
  0x14   : > { %s2452_s5 = scalar_lea.hbm %s3291_s1, 4608 }
  0x15   : > { %p2718_p10 = pnand %p2318_p9, %p2690_p1  ;;  %p2453_p11 = scmp.ne.s32.totalorder %s3291_s1, %s2452_s5 }
  0x16   : > { %p2459_p3 = scmp.lt.u32.totalorder %s2452_s5, %s3291_s1 }
  0x17   : > { %p2454_p12 = pneg %p2718_p10 }
  0x19   : > { %p2455_p13 = pnand %p2454_p12, %p2453_p11 }
  0x1b   : > { %p2456_p0 = pneg %p2455_p13 }
  0x1d   : > { %p2461_p5 = pnand %p2459_p3, %p2456_p0 }
  0x1f   : > { %2464 = shalt.err (!%p2461_p5)
}
  0x20   : > { %s2465_s10 = scalar_lea.vmem %s158_s26, 4608  ;;  %p2473_p1 = scmp.lt.s32.totalorder %s158_s26, %s158_s26 }
  0x21   : > { %p2466_p7 = scmp.ne.s32.totalorder %s158_s26, %s2465_s10  ;;  %p2474_p4 = scmp.lt.s32.totalorder %s2465_s10, %s2465_s10 }
  0x23   : > { %p2468_p9 = pnand %p2466_p7, %p2454_p12  ;;  %p2475_p8 = por %p2474_p4, %p2473_p1 }
  0x25   : > { %p2469_p6 = pneg %p2468_p9 }
  0x27   : > { %p2476_p2 = pnand %p2475_p8, %p2469_p6 }
  0x29   : > { %2479 = shalt.err (!%p2476_p2)
}
  0x2a   : > { %s2628_s11 = smov 64   ;;  %s2629_s18 = smov 4  }
  0x2b   : > { %2321 = dma.hbm_to_vmem [thread:$0]  (!%p2718_p10), %s3291_s1, 4608, %s158_s26, [#allocation6], %s2628_s11, %s2628_s11, %s2629_s18  }
  0x2c   : > { %s2480_s4 = scalar_lea.hbm %s3292_s2, 16 }
  0x2d   : > { %p2481_p1 = scmp.ne.s32.totalorder %s3292_s2, %s2480_s4  ;;  %p2487_p6 = scmp.lt.u32.totalorder %s2480_s4, %s3292_s2 }
  0x2f   : > { %p2483_p2 = pnand %p2481_p1, %p2454_p12 }
  0x31   : > { %p2484_p4 = pneg %p2483_p2 }
  0x33   : > { %p2489_p8 = pnand %p2487_p6, %p2484_p4 }
  0x35   : > { %2492 = shalt.err (!%p2489_p8)
}
  0x36   : > { %s2493_s26 = scalar_lea.vmem %s2722_s29, 16  ;;  %s2500_s9 = scalar_lea.vmem %s2722_s29, 32 }
  0x37   : > { %p2494_p11 = scmp.ne.s32.totalorder %s2722_s29, %s2493_s26  ;;  %p2501_p3 = scmp.lt.s32.totalorder %s2722_s29, %s2722_s29 }
  0x38   : > { %p2502_p5 = scmp.lt.s32.totalorder %s2500_s9, %s2493_s26 }
  0x39   : > { %p2496_p13 = pnand %p2494_p11, %p2454_p12 }
  0x3a   : > { %p2503_p7 = por %p2502_p5, %p2501_p3 }
  0x3b   : > { %p2497_p0 = pneg %p2496_p13 }
  0x3d   : > { %p2504_p9 = pnand %p2503_p7, %p2497_p0 }
  0x3f   : > { %2507 = shalt.err (!%p2504_p9)
}
  0x40   : > { %2324 = dma.hbm_to_vmem [thread:$0]  (!%p2718_p10), %s3292_s2, 16, %s2722_s29, [#allocation6]  }
  0x41   : > { %s29_s25 = sadd.s32 1, %s2620_s16  ;;  %s39_s28 = sadd.s32 1, %s2612_s14 }
  0x42   : > { %p30_p12 = scmp.ge.s32.totalorder %s29_s25, 8  ;;  %p46_p1 = scmp.ne.s32.totalorder %s2612_s14, %s2608_s13 }
  0x43   : > { %p47_p2 = scmp.eq.s32.totalorder %s2624_s17, 0  ;;  %p2335_p4 = scmp.lt.s32.totalorder %s2624_s17, 8 }
  0x44   : > { %s3317_s25 = smov (%p30_p12, %s29_s25), 0  ;;  %p3304_p8 = scmp.ne.s32.totalorder %s3299_s21, 0 }
  0x45   : > { %p48_p6 = por %p47_p2, %p46_p1  ;;  %s36_s30 = ssub.s32 %s2620_s16, %s3317_s25 }
  0x46   : > { %p2785_p11 = por %p3304_p8, %p46_p1  ;;  %s184_s4 = sand.u32 1, %s2612_s14  }
  0x47   : > { %p37_p13 = scmp.eq.s32.totalorder %s36_s30, 0  ;;  %s1849_s29 = sshll.u32 %s184_s4, 6 }
  0x48   : > { %s1962_s5 = sshll.u32 %s2620_s16, 10  ;;  %s188_s21 = scalar_lea.vmem [#allocation2], %s1849_s29 }
  0x49   : > { %s2794_s6 = scalar_select %p37_p13, %s2612_s14, %s39_s28  }
  0x4a   : > { %s2799_s26 = scalar_lea.hbm %s3290_s0, %s1962_s5  ;;  %s195_s9 = sshll.u32 %s188_s21, 4  ;;  %s2807_s9 = int_to_ptr.vmem [resolvable:$true] %s195_s9 }
  0x4b   : > { %p2803_p10 = pnand %p2335_p4, %p48_p6  ;;  %s2809_s19 = scalar_lea.sflag [#allocation3], %s184_s4 }
  0x4c   : > { %s2508_s28 = scalar_lea.hbm %s2799_s26, 1024  ;;  %s2513_s5 = scalar_lea.hbm %s3290_s0, 8192 }
  0x4d   : > { %p2509_p0 = scmp.ne.s32.totalorder %s2799_s26, %s2508_s28  ;;  %p2510_p3 = pneg %p2803_p10 }
  0x4e   : > { %p2514_p9 = scmp.lt.u32.totalorder %s2799_s26, %s3290_s0  ;;  %p2515_p12 = scmp.lt.u32.totalorder %s2513_s5, %s2508_s28 }
  0x4f   : > { %p2511_p5 = pnand %p2510_p3, %p2509_p0  ;;  %p2517_p2 = scmp.lt.u32.totalorder %s2508_s28, %s2799_s26 }
  0x50   : > { %p2516_p1 = por %p2515_p12, %p2514_p9 }
  0x51   : > { %p2512_p7 = pneg %p2511_p5 }
  0x52   : > { %p2518_p4 = por %p2517_p2, %p2516_p1 }
  0x54   : > { %p2519_p6 = pnand %p2518_p4, %p2512_p7 }
  0x56   : > { %2522 = shalt.err (!%p2519_p6)
}
  0x57   : > { %s2523_s4 = scalar_lea.vmem %s2807_s9, 1024  ;;  %s2630_s21 = smov [#allocation2]  }
  0x58   : > { %p2524_p8 = scmp.ne.s32.totalorder %s2807_s9, %s2523_s4  ;;  %s2528_s30 = sshll.u32 %s2630_s21, 4  ;;  %s2529_s30 = int_to_ptr.vmem [resolvable:$false] %s2528_s30 }
  0x59   : > { %s2530_s29 = scalar_lea.vmem %s2529_s30, 2048  ;;  %p2531_p5 = scmp.lt.s32.totalorder %s2807_s9, %s2529_s30 }
  0x5a   : > { %p2526_p13 = pnand %p2524_p8, %p2510_p3  ;;  %p2532_p9 = scmp.lt.s32.totalorder %s2530_s29, %s2523_s4 }
  0x5c   : > { %p2527_p0 = pneg %p2526_p13  ;;  %p2533_p12 = por %p2532_p9, %p2531_p5 }
  0x5e   : > { %p2534_p1 = pnand %p2533_p12, %p2527_p0 }
  0x60   : > { %2537 = shalt.err (!%p2534_p1)
}
  0x61   : > { %2328 = dma.hbm_to_vmem [thread:$0]  (!%p2803_p10), %s2799_s26, 1024, %s2807_s9, %s2809_s19, %s2628_s11, %s2628_s11, %s2629_s18  }
  0x62   : > { %p3307_p3 = scmp.ne.s32.totalorder %s3302_s24, 0 }
  0x63   : > { %s2843_s28 = sand.u32 (!%p3307_p3), 1, %s2608_s13   ;;  %p3308_p7 = scmp.ne.s32.totalorder (!%p3307_p3), %s3300_s22, 0 }
  0x64   : > { %207 = sbr.rel (%p3307_p3) target bundleno = 540 (0x21c), region = 32  ;;  %s1853_s5 = sshll.u32 (!%p3307_p3), %s2843_s28, 6 }
  0x65   : > { %s210_s7 = scalar_lea.sflag (!%p3307_p3), [#allocation3], %s2843_s28  ;;  %s2847_s8 = scalar_lea.vmem (!%p3307_p3), [#allocation2], %s1853_s5 }
  0x6b   : > { %2591 = dma.done.wait (%p3308_p7), %s210_s7, 1024  }
  0x6c   : > { %2593 = vsyncadd (%p3308_p7), %s210_s7, 4294966272  ;;  %p3309_p10 = scmp.ne.s32.totalorder %s3298_s20, 0 }
  0x6e   : > { %2595 = dma.done.wait (%p3309_p10), [#allocation6], 4624  }
  0x6f   : > { %2597 = vsyncadd (%p3309_p10), [#allocation6], 4294962672  ;;  %v2631_v0 = vmov 0.0   ;;  %vm2632_vm0 = vmmov 0   ;;  %v2395_v1 = vld [vmem:[#allocation5 + $0x20] sm:$0xff]   ;;  %v2396_v2 = vld [vmem:[#allocation5 + $0x28] sm:$0xff]  }
  0x70   : > { %2296 = vmatprep.subr.bf16.mxu1 %v2631_v0  ;;  %2044 = vmatprep.subr.bf16.mxu0 %v2631_v0  ;;  %v2866_v3 = vld [vmem:[%s2847_s8 + $0x10] sm:$0xff]   ;;  %v2869_v4 = vld [vmem:[%s2847_s8 + $0x18] sm:$0xff]   ;;  %vm297_vm1 = vsmask.f32 7424  ;;  %v245_v9 = vld [vmem:[%s2847_s8] sm:$0xf] }
  0x71   : > { %2060 = vmatprep.mubr.msk.bf16.mxu1 %vm2632_vm0, %v2631_v0  ;;  %2052 = vmatprep.mubr.msk.bf16.mxu0 %vm2632_vm0, %v2631_v0  ;;  %v2397_v5 = vld [vmem:[#allocation5 + $0x30] sm:$0xff]   ;;  %v314_v6 = vshll.u32 %v2866_v3, 16  ;;  %v318_v7 = vshrl.u32 %v2866_v3, 16  ;;  %v322_v8 = vshll.u32 %v2869_v4, 16  ;;  %v2878_v10 = vld [vmem:[%s2847_s8 + $0x4] sm:$0xf] }
  0x72   : > { %2300 = vmatpush3.bf16.msra.mxu1 %v2395_v1  ;;  %2045 = vmatpush3.bf16.msra.mxu0 %v2395_v1  ;;  %v2398_v11 = vld [vmem:[#allocation5 + $0x38] sm:$0xff]   ;;  %v2881_v13 = vcombine.low %v245_v9, %v2878_v10  ;;  %v2884_v15 = vld [vmem:[%s2847_s8 + $0x8] sm:$0xff]   ;;  %v2887_v16 = vld [vmem:[%s2847_s8 + $0x20] sm:$0xf]  ;;  %vm361_vm2 = vcmask 523264   ;;  %v326_v27 = vshrl.u32 %v2869_v4, 16 }
  0x73   : > { %2297 = vmatprep.subr.bf16.mxu1 %v2631_v0  ;;  %2046 = vmatprep.subr.bf16.mxu0 %v2631_v0  ;;  %v316_v12 = vrot.slane %v314_v6, 1  ;;  %v324_v14 = vrot.slane %v322_v8, 1  ;;  %v262_v17 = vld [vmem:[%s2847_s8 + $0x24] sm:$0x1]  ;;  %v306_v22 = vshll.u32 %v2884_v15, 16  ;;  %v310_v31 = vshrl.u32 %v2884_v15, 16 }
  0x74   : > { %v299_v19 = vshrl.u32 %v2881_v13, 16  ;;  %v301_v20 = vshll.u32 %v2881_v13, 16  ;;  %v2895_v21 = vcombine.low %v2887_v16, %v262_v17  ;;  %v2401_v25 = vld [vmem:[#allocation5] sm:$0xff]   ;;  %v2402_v33 = vld [vmem:[#allocation5 + $0x8] sm:$0xff]   ;;  %v2407_v40 = vld [vmem:[#allocation5 + $0x10] sm:$0xff]   ;;  %v572_v48 = vrot.slane %v2884_v15, 1 }
  0x75   : > { %v320_v18 = vor.u32 %v318_v7, %v316_v12  ;;  %v308_v26 = vrot.slane %v306_v22, 1  ;;  %v2406_v30 = vld [vmem:[#allocation5 + $0x40] sm:$0xff]   ;;  %v328_v34 = vor.u32 %v326_v27, %v324_v14  ;;  %v2408_v36 = vld [vmem:[#allocation5 + $0x48] sm:$0xff]   ;;  %v2409_v42 = vld [vmem:[#allocation5 + $0x50] sm:$0xff]   ;;  %vm570_vm3 = vcmask 1046528   ;;  %s2304_s20 = smul.u32 72, %s2843_s28 }
  0x76   : > { %2301 = vmatpush3.bf16.msra.mxu1 %v2396_v2  ;;  %2047 = vmatpush3.bf16.msra.mxu0 %v2396_v2  ;;  %v303_v23 = vrot.slane %v301_v20, 1  ;;  %v330_v28 = vshll.u32 %v2895_v21, 16  ;;  %v557_v38 = vld [vmem:[%s2847_s8] sm:$0xe]  ;;  %v334_v44 = vshrl.u32 %v2895_v21, 16  ;;  %v2410_v45 = vld [vmem:[#allocation5 + $0x18] sm:$0xff]  }
  0x77   : > { %2298 = vmatprep.subr.bf16.mxu1 %v2631_v0  ;;  %2048 = vmatprep.subr.bf16.mxu0 %v2631_v0  ;;  %v325_v24 = vsel %vm297_vm1, %v320_v18, %v324_v14  ;;  %v312_v37 = vor.u32 %v310_v31, %v308_v26  ;;  %v1880_v43 = vcombine.low %v557_v38, %v2878_v10  ;;  %v2411_v46 = vld [vmem:[#allocation5 + $0x58] sm:$0xff]   ;;  %v2414_v51 = vld [vmem:[#allocation5 + $0x80] sm:$0xff]   ;;  %v574_v52 = vrot.slane %v2866_v3, 1  ;;  %v2416_v53 = vld [vmem:[#allocation5 + $0x88] sm:$0xff]   ;;  %s3202_s22 = scalar_lea.vmem [#allocation8], %s2304_s20  ;;  %s2305_s24 = smul.u32 1152, %s2616_s15 }
  0x78   : > { %v304_v29 = vor.u32 %v303_v23, %v299_v19  ;;  %v332_v35 = vrot.slane %v330_v28, 1  ;;  %v2413_v54 = vld [vmem:[#allocation5 + $0x60] sm:$0xff]   ;;  %v2418_v56 = vld [vmem:[#allocation5 + $0x90] sm:$0xff]   ;;  %v2415_v57 = vld [vmem:[#allocation5 + $0x68] sm:$0xff]   ;;  %v576_v58 = vrot.slane %v2869_v4, 1  ;;  %v578_v63 = vrot.slane %v2895_v21, 1 }
  0x79   : > { %v317_v41 = vsel %vm297_vm1, %v312_v37, %v316_v12  ;;  %v571_v47 = vrot.slane %v1880_v43, 1  ;;  %v575_v55 = vsel %vm570_vm3, %v572_v48, %v574_v52  ;;  %v2421_v59 = vld [vmem:[#allocation5 + $0x98] sm:$0xff]   ;;  %v2417_v60 = vld [vmem:[#allocation5 + $0x70] sm:$0xff]   ;;  %v700_v1 = vld [vmem:[%s2847_s8 + $0x8] sm:$0xe]  ;;  %v1870_v21 = vcombine.low %v2887_v16, %v2887_v16  ;;  %s1737_s11 = sshll.u32 %s3202_s22, 4  ;;  %s3238_s9 = scalar_lea.hbm %s3293_s3, %s2305_s24  ;;  %s3240_s11 = int_to_ptr.vmem [resolvable:$true] %s1737_s11 }
  0x7a   : > { %2302 = vmatpush3.bf16.msra.mxu1 %v2397_v5  ;;  %2049 = vmatpush3.bf16.msra.mxu0 %v2397_v5  ;;  %v309_v32 = vsel %vm297_vm1, %v304_v29, %v308_v26  ;;  %v333_v39 = vsel %vm297_vm1, %v328_v34, %v332_v35  ;;  %v336_v49 = vor.u32 %v334_v44, %v332_v35  ;;  %v2419_v62 = vld [vmem:[#allocation5 + $0x78] sm:$0xff]   ;;  %v2966_v2 = vld [vmem:[%s2847_s8 + $0xc] sm:$0xf]  ;;  %v2972_v7 = vld [vmem:[%s2847_s8 + $0x10] sm:$0xff]   ;;  %vm886_vm4 = vsmask.f32 6400 }
  0x7b   : > { %2299 = vmatprep.subr.bf16.mxu1 %v2631_v0  ;;  %2050 = vmatprep.subr.bf16.mxu0 %v2631_v0  ;;  %v573_v50 = vsel %vm570_vm3, %v571_v47, %v572_v48  ;;  %v577_v61 = vsel %vm570_vm3, %v574_v52, %v576_v58  ;;  %v579_v5 = vsel %vm570_vm3, %v576_v58, %v578_v63  ;;  %v896_v10 = vshrl.u32 %v2972_v7, 16  ;;  %v2425_v22 = vld [vmem:[#allocation5 + $0xc0] sm:$0xff]   ;;  %v2428_v28 = vld [vmem:[#allocation5 + $0xc8] sm:$0xff]   ;;  %v2431_v38 = vld [vmem:[#allocation5 + $0xd0] sm:$0xff]   ;;  %s1723_s15 = scalar_lea.sflag [#allocation4], %s2843_s28  ;;  %s2538_s10 = scalar_lea.vmem %s3240_s11, 1152 }
  0x7c   : > { %v1890_v6 = vcombine.low %v700_v1, %v2966_v2  ;;  %v745_v27 = vrot.slane %v2972_v7, 1  ;;  %v708_v31 = vld [vmem:[%s2847_s8 + $0x28] sm:$0xf]  ;;  %v2424_v34 = vld [vmem:[#allocation5 + $0xa0] sm:$0xff]   ;;  %v2430_v47 = vld [vmem:[#allocation5 + $0xb0] sm:$0xff]   ;;  %vm1064_vm5 = vcmask 1045504   ;;  %p2539_p2 = scmp.ne.s32.totalorder %s3240_s11, %s2538_s10 }
  0x7d   : > { %v898_v14 = vrot.slane %v896_v10, 1  ;;  %v2434_v52 = vld [vmem:[#allocation5 + $0xb8] sm:$0xff]   ;;  %v1051_v1 = vld [vmem:[%s2847_s8 + $0x8] sm:$0xc]  ;;  %v2440_v10 = vld [vmem:[#allocation5 + $0x100] sm:$0xff]   ;;  %vm1558_vm6 = vcmask 1044480  }
  0x7e   : > { %2303 = vmatpush3.bf16.msra.mxu1 %v2398_v11  ;;  %2051 = vmatpush3.bf16.msra.mxu0 %v2398_v11  ;;  %v888_v8 = vshrl.u32 %v1890_v6, 16  ;;  %v891_v9 = vshll.u32 %v1890_v6, 16  ;;  %v899_v11 = vshll.u32 %v2972_v7, 16  ;;  %v744_v26 = vrot.slane %v1890_v6, 1  ;;  %p2540_p4 = pnand %p2539_p2, %p2785_p11  ;;  %s2633_s19 = smov [#allocation8]  }
  0x7f   : > { %2072 = vmatprep.subr.bf16.mxu1 %v2631_v0  ;;  %2100 = vmatprep.subr.bf16.mxu0 %v2631_v0  ;;  %vm1380_vm7 = vsmask.f32 5376  ;;  %s2542_s4 = sshll.u32 %s2633_s19, 4  ;;  %s2543_s4 = int_to_ptr.vmem [resolvable:$false] %s2542_s4 }
  0x80   : > { %v890_v12 = vrot.slane %v888_v8, 1  ;;  %v1914_v8 = vcombine.low %v1051_v1, %v2966_v2  ;;  %p2541_p6 = pneg %p2540_p4  ;;  %s2544_s21 = scalar_lea.vmem %s2543_s4, 2304 }
  0x81   : > { %2061 = vmatmul.mubr.msk.bf16.vlgmr.msra.gmra.mrb[0].mxu1 %vm361_vm2, %v325_v24  ;;  %2053 = vmatmul.mubr.msk.bf16.vlgmr.msra.gmra.mrb[0].mxu0 %vm361_vm2, %v309_v32  ;;  %v873_v32 = vld [vmem:[%s2847_s8 + $0x2c] sm:$0x3]  ;;  %p2545_p8 = scmp.lt.s32.totalorder %s3240_s11, %s2543_s4  ;;  %p2546_p13 = scmp.lt.s32.totalorder %s2544_s21, %s2538_s10 }
  0x82   : > { %2073 = vmatpush3.bf16.msra.mxu1 %v2401_v25  ;;  %2064 = vmatprep.mubr.msk.bf16.mxu1 %vm2632_vm0, %v2631_v0  ;;  %v2999_v25 = vld [vmem:[%s2847_s8 + $0x20] sm:$0xff]  }
  0x83   : > { %2074 = vmatprep.subr.bf16.mxu1 %v2631_v0  ;;  %2101 = vmatpush3.bf16.msra.mxu0 %v2406_v30  ;;  %v914_v29 = vshrl.u32 %v2999_v25, 16  ;;  %v917_v30 = vshll.u32 %v2999_v25, 16  ;;  %p2547_p0 = por %p2546_p13, %p2545_p8 }
  0x84   : > { %2056 = vmatprep.mubr.msk.bf16.mxu0 %vm2632_vm0, %v2631_v0  ;;  %2102 = vmatprep.subr.bf16.mxu0 %v2631_v0 }
  0x85   : > { %v919_v37 = vrot.slane %v917_v30, 2  ;;  %p2548_p5 = pnand %p2547_p0, %p2541_p6 }
  0x86   : > { %2075 = vmatpush3.bf16.msra.mxu1 %v2402_v33  ;;  %v746_v33 = vsel %vm570_vm3, %v744_v26, %v745_v27 }
  0x87   : > { %2076 = vmatprep.subr.bf16.mxu1 %v2631_v0  ;;  %2103 = vmatpush3.bf16.msra.mxu0 %v2408_v36  ;;  %v916_v36 = vrot.slane %v914_v29, 1  ;;  %v2449_v29 = vld [vmem:[#allocation5 + $0xf8] sm:$0xff]  }
  0x88   : > { %2104 = vmatprep.subr.bf16.mxu0 %v2631_v0 }
  0x89   : > { %2065 = vmatmul.mubr.msk.bf16.gmra.mrb[4].mxu1 %vm361_vm2, %v333_v39  ;;  %2057 = vmatmul.mubr.msk.bf16.gmra.mrb[4].mxu0 %vm361_vm2, %v317_v41  ;;  %v3015_v39 = vcombine.low %v708_v31, %v873_v32  ;;  %v2427_v41 = vld [vmem:[#allocation5 + $0xa8] sm:$0xff]  }
  0x8a   : > { %2077 = vmatpush3.bf16.msra.mxu1 %v2407_v40  ;;  %2068 = vmatprep.mubr.msk.bf16.mxu1 %vm2632_vm0, %v2631_v0 }
  0x8b   : > { %2078 = vmatprep.subr.bf16.mxu1 %v2631_v0  ;;  %2105 = vmatpush3.bf16.msra.mxu0 %v2409_v42  ;;  %v920_v42 = vor.u32 %v919_v37, %v916_v36  ;;  %v923_v43 = vshrl.u32 %v3015_v39, 16  ;;  %v926_v44 = vshll.u32 %v3015_v39, 16 }
  0x8c   : > { %2108 = vmatprep.mubr.msk.bf16.mxu0 %vm2632_vm0, %v2631_v0  ;;  %2106 = vmatprep.subr.bf16.mxu0 %v2631_v0 }
  0x8e   : > { %2079 = vmatpush3.bf16.msra.mxu1 %v2410_v45  ;;  %v2435_v45 = vld [vmem:[#allocation5 + $0xd8] sm:$0xff]  }
  0x8f   : > { %2128 = vmatprep.subr.bf16.mxu1 %v2631_v0  ;;  %2107 = vmatpush3.bf16.msra.mxu0 %v2411_v46 }
  0x90   : > { %2156 = vmatprep.subr.bf16.mxu0 %v2631_v0 }
  0x91   : > { %2069 = vmatmul.mubr.msk.bf16.gmra.mrb[8].mxu1 %vm361_vm2, %v336_v49  ;;  %v925_v49 = vrot.slane %v923_v43, 1 }
  0x92   : > { %2080 = vmatprep.mubr.msk.bf16.mxu1 %vm2632_vm0, %v2631_v0  ;;  %2109 = vmatmul.mubr.msk.bf16.vlgmr.msra.gmra.mrb[8].mxu0 %vm361_vm2, %v573_v50  ;;  %v928_v50 = vrot.slane %v926_v44, 2 }
  0x93   : > { %2157 = vmatpush3.bf16.msra.mxu0 %v2414_v51  ;;  %2112 = vmatprep.mubr.msk.bf16.mxu0 %vm2632_vm0, %v2631_v0  ;;  %v749_v51 = vrot.slane %v2999_v25, 1 }
  0x94   : > { %2158 = vmatprep.subr.bf16.mxu0 %v2631_v0 }
  0x97   : > { %2159 = vmatpush3.bf16.msra.mxu0 %v2416_v53  ;;  %v709_v53 = vld [vmem:[%s2847_s8 + $0x2c] sm:$0x1] }
  0x98   : > { %2160 = vmatprep.subr.bf16.mxu0 %v2631_v0 }
  0x99   : > { %2081 = vmatmul.mubr.msk.bf16.vlgmr.msra.gmra.mrb[12].mxu1 %vm361_vm2, %v2881_v13  ;;  %v893_v13 = vrot.slane %v891_v9, 2 }
  0x9a   : > { %2129 = vmatpush3.bf16.msra.mxu1 %v2413_v54  ;;  %2084 = vmatprep.mubr.msk.bf16.mxu1 %vm2632_vm0, %v2631_v0  ;;  %v929_v54 = vor.u32 %v928_v50, %v925_v49 }
  0x9b   : > { %2113 = vmatmul.mubr.msk.bf16.gmra.mrb[12].mxu0 %vm361_vm2, %v575_v55  ;;  %2130 = vmatprep.subr.bf16.mxu1 %v2631_v0  ;;  %v894_v17 = vor.u32 %v893_v13, %v890_v12  ;;  %v1065_v12 = vrot.slane %v1914_v8, 2  ;;  %v1066_v13 = vrot.slane %v2972_v7, 2  ;;  %v3088_v7 = vld [vmem:[%s2847_s8 + $0x28] sm:$0xff]  }
  0x9c   : > { %2116 = vmatprep.mubr.msk.bf16.mxu0 %vm2632_vm0, %v2631_v0  ;;  %2161 = vmatpush3.bf16.msra.mxu0 %v2418_v56  ;;  %v1894_v56 = vcombine.low %v708_v31, %v709_v53 }
  0x9d   : > { %2162 = vmatprep.subr.bf16.mxu0 %v2631_v0 }
  0x9e   : > { %2131 = vmatpush3.bf16.msra.mxu1 %v2415_v57  ;;  %v930_v57 = vsel %vm886_vm4, %v920_v42, %v929_v54  ;;  %v751_v58 = vrot.slane %v1894_v56, 1 }
  0x9f   : > { %2132 = vmatprep.subr.bf16.mxu1 %v2631_v0 }
  0xa0   : > { %2163 = vmatpush3.bf16.msra.mxu0 %v2421_v59  ;;  %v1194_v59 = vld [vmem:[%s2847_s8 + $0x10] sm:$0xc] }
  0xa1   : > { %2085 = vmatmul.mubr.msk.bf16.gmra.mrb[16].mxu1 %vm361_vm2, %v2884_v15  ;;  %2212 = vmatprep.subr.bf16.mxu0 %v2631_v0  ;;  %v901_v15 = vrot.slane %v899_v11, 2  ;;  %v3074_v11 = vld [vmem:[%s2847_s8 + $0x20] sm:$0xff]  }
  0xa2   : > { %2088 = vmatprep.mubr.msk.bf16.mxu1 %vm2632_vm0, %v2631_v0  ;;  %2133 = vmatpush3.bf16.msra.mxu1 %v2417_v60  ;;  %v3053_v60 = vld [vmem:[%s2847_s8 + $0x14] sm:$0xf]  ;;  %v1241_v2 = vrot.slane %v3074_v11, 2  ;;  %v1399_v49 = vshrl.u32 %v3074_v11, 16  ;;  %v1402_v50 = vshll.u32 %v3074_v11, 16 }
  0xa3   : > { %2117 = vmatmul.mubr.msk.bf16.gmra.mrb[16].mxu0 %vm361_vm2, %v577_v61  ;;  %2134 = vmatprep.subr.bf16.mxu1 %v2631_v0  ;;  %v902_v18 = vor.u32 %v901_v15, %v898_v14  ;;  %v752_v61 = vsel %vm570_vm3, %v749_v51, %v751_v58  ;;  %v2443_v14 = vld [vmem:[#allocation5 + $0x108] sm:$0xff]   ;;  %v1067_v15 = vsel %vm1064_vm5, %v1065_v12, %v1066_v13 }
  0xa4   : > { %2120 = vmatprep.mubr.msk.bf16.mxu0 %vm2632_vm0, %v2631_v0  ;;  %v1401_v53 = vrot.slane %v1399_v49, 2 }
  0xa6   : > { %2135 = vmatpush3.bf16.msra.mxu1 %v2419_v62  ;;  %v3057_v62 = vcombine.low %v1194_v59, %v3053_v60  ;;  %v1367_v59 = vld [vmem:[%s2847_s8 + $0x34] sm:$0x7] }
  0xa7   : > { %2184 = vmatprep.subr.bf16.mxu1 %v2631_v0 }
  0xa8   : > { %v1382_v36 = vshrl.u32 %v3057_v62, 16  ;;  %v1385_v37 = vshll.u32 %v3057_v62, 16 }
  0xa9   : > { %2089 = vmatmul.mubr.msk.bf16.gmra.mrb[20].mxu1 %vm361_vm2, %v2866_v3  ;;  %v2984_v3 = vld [vmem:[%s2847_s8 + $0x18] sm:$0xff]  }
  0xaa   : > { %2092 = vmatprep.mubr.msk.bf16.mxu1 %vm2632_vm0, %v2631_v0  ;;  %v905_v19 = vshrl.u32 %v2984_v3, 16  ;;  %v908_v20 = vshll.u32 %v2984_v3, 16  ;;  %v747_v40 = vrot.slane %v2984_v3, 1  ;;  %v1387_v43 = vrot.slane %v1385_v37, 3 }
  0xab   : > { %2121 = vmatmul.mubr.msk.bf16.gmra.mrb[20].mxu0 %vm361_vm2, %v579_v5  ;;  %v1238_v5 = vrot.slane %v3057_v62, 2 }
  0xac   : > { %2124 = vmatprep.mubr.msk.bf16.mxu0 %vm2632_vm0, %v2631_v0  ;;  %v907_v23 = vrot.slane %v905_v19, 1  ;;  %v910_v24 = vrot.slane %v908_v20, 2  ;;  %v748_v46 = vsel %vm570_vm3, %v745_v27, %v747_v40  ;;  %v750_v55 = vsel %vm570_vm3, %v747_v40, %v749_v51  ;;  %v2446_v19 = vld [vmem:[#allocation5 + $0x110] sm:$0xff]  }
  0xad   : > { %v1068_v20 = vrot.slane %v2984_v3, 2  ;;  %v2445_v3 = vld [vmem:[#allocation5 + $0xf0] sm:$0xff]   ;;  %v1562_v51 = vrot.slane %v3074_v11, 3 }
  0xae   : > { %v911_v16 = vor.u32 %v910_v24, %v907_v23  ;;  %v3101_v23 = vld [vmem:[%s2847_s8 + $0x30] sm:$0xf]  ;;  %v1203_v24 = vld [vmem:[%s2847_s8 + $0x34] sm:$0x3] }
  0xaf   : > { %v1069_v26 = vsel %vm1064_vm5, %v1066_v13, %v1068_v20 }
  0xb0   : > { %v912_v35 = vsel %vm886_vm4, %v902_v18, %v911_v16  ;;  %v921_v48 = vsel %vm886_vm4, %v911_v16, %v920_v42  ;;  %v1928_v16 = vcombine.low %v3101_v23, %v1203_v24  ;;  %v1384_v42 = vrot.slane %v1382_v36, 2 }
  0xb1   : > { %2093 = vmatmul.mubr.msk.bf16.gmra.mrb[24].mxu1 %vm361_vm2, %v2869_v4  ;;  %v903_v4 = vsel %vm886_vm4, %v894_v17, %v902_v18  ;;  %v2439_v17 = vld [vmem:[#allocation5 + $0xe0] sm:$0xff]  }
  0xb2   : > { %2096 = vmatprep.mubr.msk.bf16.mxu1 %vm2632_vm0, %v2631_v0  ;;  %v1245_v30 = vrot.slane %v1928_v16, 2 }
  0xb3   : > { %2125 = vmatmul.mubr.msk.bf16.gmra.mrb[24].mxu0 %vm361_vm2, %v578_v63  ;;  %v3060_v63 = vld [vmem:[%s2847_s8 + $0x18] sm:$0xff]  }
  0xb4   : > { %2164 = vmatprep.mubr.msk.bf16.mxu0 %vm2632_vm0, %v2631_v0  ;;  %v1239_v6 = vrot.slane %v3060_v63, 2 }
  0xb6   : > { %v1240_v9 = vsel %vm1064_vm5, %v1238_v5, %v1239_v6  ;;  %v1242_v18 = vsel %vm1064_vm5, %v1239_v6, %v1241_v2 }
  0xb9   : > { %2097 = vmatmul.mubr.msk.bf16.gmra.mrb[28].mxu1 %vm361_vm2, %v1870_v21  ;;  %v2442_v21 = vld [vmem:[#allocation5 + $0xe8] sm:$0xff]  }
  0xba   : > { %2136 = vmatprep.mubr.msk.bf16.mxu1 %vm2632_vm0, %v2631_v0 }
  0xbb   : > { %2165 = vmatmul.mubr.msk.bf16.vlgmr.msra.gmra.mrb[28].mxu0 %vm361_vm2, %v903_v4  ;;  %v1243_v4 = vrot.slane %v3088_v7, 2 }
  0xbc   : > { %2213 = vmatpush3.bf16.msra.mxu0 %v2425_v22  ;;  %2168 = vmatprep.mubr.msk.bf16.mxu0 %vm2632_vm0, %v2631_v0  ;;  %v2450_v22 = vld [vmem:[#allocation5 + $0x118] sm:$0xff]  }
  0xbd   : > { %2214 = vmatprep.subr.bf16.mxu0 %v2631_v0  ;;  %v1244_v27 = vsel %vm1064_vm5, %v1241_v2, %v1243_v4  ;;  %v1246_v32 = vsel %vm1064_vm5, %v1243_v4, %v1245_v30 }
  0xc0   : > { %2215 = vmatpush3.bf16.msra.mxu0 %v2428_v28  ;;  %v1070_v28 = vrot.slane %v2999_v25, 2  ;;  %v1072_v25 = vrot.slane %v3015_v39, 2  ;;  %v1393_v39 = vshll.u32 %v3060_v63, 16 }
  0xc1   : > { %2137 = vmatmul.mubr.msk.bf16.vlgmr.msra.gmra.mrb[32].mxu1 %vm361_vm2, %v746_v33  ;;  %2216 = vmatprep.subr.bf16.mxu0 %v2631_v0  ;;  %v1545_v33 = vld [vmem:[%s2847_s8 + $0x10] sm:$0x8] }
  0xc2   : > { %2185 = vmatpush3.bf16.msra.mxu1 %v2424_v34  ;;  %2140 = vmatprep.mubr.msk.bf16.mxu1 %vm2632_vm0, %v2631_v0  ;;  %v1071_v31 = vsel %vm1064_vm5, %v1068_v20, %v1070_v28  ;;  %v1073_v34 = vsel %vm1064_vm5, %v1070_v28, %v1072_v25 }
  0xc3   : > { %2169 = vmatmul.mubr.msk.bf16.gmra.mrb[32].mxu0 %vm361_vm2, %v912_v35  ;;  %2186 = vmatprep.subr.bf16.mxu1 %v2631_v0  ;;  %v1948_v35 = vcombine.low %v1545_v33, %v3053_v60  ;;  %v1564_v60 = vrot.slane %v3088_v7, 3 }
  0xc4   : > { %2172 = vmatprep.mubr.msk.bf16.mxu0 %vm2632_vm0, %v2631_v0  ;;  %2217 = vmatpush3.bf16.msra.mxu0 %v2431_v38  ;;  %v1390_v38 = vshrl.u32 %v3060_v63, 16 }
  0xc5   : > { %2218 = vmatprep.subr.bf16.mxu0 %v2631_v0  ;;  %v1559_v40 = vrot.slane %v1948_v35, 3  ;;  %v1565_v5 = vsel %vm1558_vm6, %v1562_v51, %v1564_v60 }
  0xc6   : > { %2187 = vmatpush3.bf16.msra.mxu1 %v2427_v41  ;;  %v1560_v41 = vrot.slane %v3060_v63, 3  ;;  %v1392_v44 = vrot.slane %v1390_v38, 2 }
  0xc7   : > { %2188 = vmatprep.subr.bf16.mxu1 %v2631_v0 }
  0xc8   : > { %2219 = vmatpush3.bf16.msra.mxu0 %v2435_v45  ;;  %v1395_v45 = vrot.slane %v1393_v39, 3 }
  0xc9   : > { %2141 = vmatmul.mubr.msk.bf16.gmra.mrb[36].mxu1 %vm361_vm2, %v748_v46  ;;  %2268 = vmatprep.subr.bf16.mxu0 %v2631_v0  ;;  %v1561_v46 = vsel %vm1558_vm6, %v1559_v40, %v1560_v41 }
  0xca   : > { %2144 = vmatprep.mubr.msk.bf16.mxu1 %vm2632_vm0, %v2631_v0  ;;  %2189 = vmatpush3.bf16.msra.mxu1 %v2430_v47  ;;  %v1388_v47 = vor.u32 %v1387_v43, %v1384_v42 }
  0xcb   : > { %2173 = vmatmul.mubr.msk.bf16.gmra.mrb[36].mxu0 %vm361_vm2, %v921_v48  ;;  %2190 = vmatprep.subr.bf16.mxu1 %v2631_v0  ;;  %v1396_v48 = vor.u32 %v1395_v45, %v1392_v44 }
  0xcc   : > { %2176 = vmatprep.mubr.msk.bf16.mxu0 %vm2632_vm0, %v2631_v0 }
  0xce   : > { %2191 = vmatpush3.bf16.msra.mxu1 %v2434_v52  ;;  %v1397_v52 = vsel %vm1380_vm7, %v1388_v47, %v1396_v48 }
  0xcf   : > { %2240 = vmatprep.subr.bf16.mxu1 %v2631_v0 }
  0xd1   : > { %2145 = vmatmul.mubr.msk.bf16.gmra.mrb[40].mxu1 %vm361_vm2, %v750_v55  ;;  %v1563_v55 = vsel %vm1558_vm6, %v1560_v41, %v1562_v51 }
  0xd2   : > { %2148 = vmatprep.mubr.msk.bf16.mxu1 %vm2632_vm0, %v2631_v0 }
  0xd3   : > { %2177 = vmatmul.mubr.msk.bf16.gmra.mrb[40].mxu0 %vm361_vm2, %v930_v57  ;;  %v1408_v57 = vshrl.u32 %v3088_v7, 16 }
  0xd4   : > { %2180 = vmatprep.mubr.msk.bf16.mxu0 %vm2632_vm0, %v2631_v0 }
  0xd5   : > { %v1410_v63 = vrot.slane %v1408_v57, 2 }
  0xd9   : > { %2149 = vmatmul.mubr.msk.bf16.gmra.mrb[44].mxu1 %vm361_vm2, %v752_v61  ;;  %v1938_v61 = vcombine.low %v3101_v23, %v1367_v59 }
  0xda   : > { %2152 = vmatprep.mubr.msk.bf16.mxu1 %vm2632_vm0, %v2631_v0 }
  0xdb   : > { %2181 = vmatmul.mubr.msk.bf16.gmra.mrb[44].mxu0 %vm361_vm2, %v929_v54  ;;  %v1404_v54 = vrot.slane %v1402_v50, 3  ;;  %v1417_v8 = vshrl.u32 %v1938_v61, 16 }
  0xdc   : > { %2220 = vmatprep.mubr.msk.bf16.mxu0 %vm2632_vm0, %v2631_v0 }
  0xdd   : > { %v1405_v56 = vor.u32 %v1404_v54, %v1401_v53  ;;  %v1419_v12 = vrot.slane %v1417_v8, 2 }
  0xdf   : > { %v1406_v62 = vsel %vm1380_vm7, %v1396_v48, %v1405_v56 }
  0xe1   : > { %2153 = vmatmul.mubr.msk.bf16.gmra.mrb[48].mxu1 %vm361_vm2, %v751_v58  ;;  %v1411_v58 = vshll.u32 %v3088_v7, 16 }
  0xe2   : > { %2192 = vmatprep.mubr.msk.bf16.mxu1 %vm2632_vm0, %v2631_v0 }
  0xe3   : > { %2221 = vmatmul.mubr.msk.bf16.vlgmr.msra.gmra.mrb[48].mxu0 %vm361_vm2, %v1240_v9  ;;  %v1413_v1 = vrot.slane %v1411_v58, 3  ;;  %v1420_v9 = vshll.u32 %v1938_v61, 16 }
  0xe4   : > { %2269 = vmatpush3.bf16.msra.mxu0 %v2440_v10  ;;  %2224 = vmatprep.mubr.msk.bf16.mxu0 %vm2632_vm0, %v2631_v0  ;;  %v1566_v10 = vrot.slane %v1938_v61, 3 }
  0xe5   : > { %2270 = vmatprep.subr.bf16.mxu0 %v2631_v0  ;;  %v1414_v6 = vor.u32 %v1413_v1, %v1410_v63  ;;  %v1422_v13 = vrot.slane %v1420_v9, 3 }
  0xe6   : > { %v1567_v2 = vsel %vm1558_vm6, %v1564_v60, %v1566_v10 }
  0xe7   : > { %v1415_v11 = vsel %vm1380_vm7, %v1405_v56, %v1414_v6 }
  0xe8   : > { %2271 = vmatpush3.bf16.msra.mxu0 %v2443_v14  ;;  %v1423_v14 = vor.u32 %v1422_v13, %v1419_v12 }
  0xe9   : > { %2193 = vmatmul.mubr.msk.bf16.vlgmr.msra.gmra.mrb[52].mxu1 %vm361_vm2, %v1067_v15  ;;  %2272 = vmatprep.subr.bf16.mxu0 %v2631_v0 }
  0xea   : > { %2241 = vmatpush3.bf16.msra.mxu1 %v2439_v17  ;;  %2196 = vmatprep.mubr.msk.bf16.mxu1 %vm2632_vm0, %v2631_v0  ;;  %v1424_v15 = vsel %vm1380_vm7, %v1414_v6, %v1423_v14 }
  0xeb   : > { %2225 = vmatmul.mubr.msk.bf16.gmra.mrb[52].mxu0 %vm361_vm2, %v1242_v18  ;;  %2242 = vmatprep.subr.bf16.mxu1 %v2631_v0 }
  0xec   : > { %2228 = vmatprep.mubr.msk.bf16.mxu0 %vm2632_vm0, %v2631_v0  ;;  %2273 = vmatpush3.bf16.msra.mxu0 %v2446_v19 }
  0xed   : > { %2274 = vmatprep.subr.bf16.mxu0 %v2631_v0 }
  0xee   : > { %2243 = vmatpush3.bf16.msra.mxu1 %v2442_v21 }
  0xef   : > { %2244 = vmatprep.subr.bf16.mxu1 %v2631_v0 }
  0xf0   : > { %2275 = vmatpush3.bf16.msra.mxu0 %v2450_v22 }
  0xf1   : > { %2197 = vmatmul.mubr.msk.bf16.gmra.mrb[56].mxu1 %vm361_vm2, %v1069_v26 }
  0xf2   : > { %2200 = vmatprep.mubr.msk.bf16.mxu1 %vm2632_vm0, %v2631_v0  ;;  %2245 = vmatpush3.bf16.msra.mxu1 %v2445_v3 }
  0xf3   : > { %2229 = vmatmul.mubr.msk.bf16.gmra.mrb[56].mxu0 %vm361_vm2, %v1244_v27  ;;  %2246 = vmatprep.subr.bf16.mxu1 %v2631_v0 }
  0xf4   : > { %2232 = vmatprep.mubr.msk.bf16.mxu0 %vm2632_vm0, %v2631_v0 }
  0xf6   : > { %2247 = vmatpush3.bf16.msra.mxu1 %v2449_v29 }
  0xf9   : > { %2201 = vmatmul.mubr.msk.bf16.gmra.mrb[60].mxu1 %vm361_vm2, %v1071_v31 }
  0xfa   : > { %2204 = vmatprep.mubr.msk.bf16.mxu1 %vm2632_vm0, %v2631_v0 }
  0xfb   : > { %2233 = vmatmul.mubr.msk.bf16.gmra.mrb[60].mxu0 %vm361_vm2, %v1246_v32 }
  0xfc   : > { %2236 = vmatprep.mubr.msk.bf16.mxu0 %vm2632_vm0, %v2631_v0 }
 0x101   : > { %2205 = vmatmul.mubr.msk.bf16.gmra.mrb[64].mxu1 %vm361_vm2, %v1073_v34 }
 0x102   : > { %2208 = vmatprep.mubr.msk.bf16.mxu1 %vm2632_vm0, %v2631_v0 }
 0x103   : > { %2237 = vmatmul.mubr.msk.bf16.gmra.mrb[64].mxu0 %vm361_vm2, %v1245_v30 }
 0x104   : > { %2276 = vmatprep.mubr.msk.bf16.mxu0 %vm2632_vm0, %v2631_v0 }
 0x109   : > { %2209 = vmatmul.mubr.msk.bf16.gmra.mrb[68].mxu1 %vm361_vm2, %v1072_v25 }
 0x10a   : > { %2248 = vmatprep.mubr.msk.bf16.mxu1 %vm2632_vm0, %v2631_v0 }
 0x10b   : > { %2277 = vmatmul.mubr.msk.bf16.vlgmr.msra.gmra.mrb[68].mxu0 %vm361_vm2, %v1561_v46 }
 0x10c   : > { %2280 = vmatprep.mubr.msk.bf16.mxu0 %vm2632_vm0, %v2631_v0 }
 0x111   : > { %2249 = vmatmul.mubr.msk.bf16.vlgmr.msra.gmra.mrb[72].mxu1 %vm361_vm2, %v1397_v52 }
 0x112   : > { %2252 = vmatprep.mubr.msk.bf16.mxu1 %vm2632_vm0, %v2631_v0 }
 0x113   : > { %2281 = vmatmul.mubr.msk.bf16.gmra.mrb[72].mxu0 %vm361_vm2, %v1563_v55 }
 0x114   : > { %2284 = vmatprep.mubr.msk.bf16.mxu0 %vm2632_vm0, %v2631_v0 }
 0x119   : > { %2253 = vmatmul.mubr.msk.bf16.gmra.mrb[76].mxu1 %vm361_vm2, %v1406_v62 }
 0x11a   : > { %2256 = vmatprep.mubr.msk.bf16.mxu1 %vm2632_vm0, %v2631_v0 }
 0x11b   : > { %2285 = vmatmul.mubr.msk.bf16.gmra.mrb[76].mxu0 %vm361_vm2, %v1565_v5 }
 0x11c   : > { %2288 = vmatprep.mubr.msk.bf16.mxu0 %vm2632_vm0, %v2631_v0 }
 0x121   : > { %2257 = vmatmul.mubr.msk.bf16.gmra.mrb[80].mxu1 %vm361_vm2, %v1415_v11 }
 0x122   : > { %2260 = vmatprep.mubr.msk.bf16.mxu1 %vm2632_vm0, %v2631_v0 }
 0x123   : > { %2289 = vmatmul.mubr.msk.bf16.gmra.mrb[80].mxu0 %vm361_vm2, %v1567_v2 }
 0x124   : > { %2292 = vmatprep.mubr.msk.bf16.mxu0 %vm2632_vm0, %v2631_v0 }
 0x129   : > { %2261 = vmatmul.mubr.msk.bf16.gmra.mrb[84].mxu1 %vm361_vm2, %v1424_v15 }
 0x12a   : > { %2264 = vmatprep.mubr.msk.bf16.mxu1 %vm2632_vm0, %v2631_v0 }
 0x12b   : > { %2293 = vmatmul.mubr.msk.bf16.gmra.mrb[84].mxu0 %vm361_vm2, %v1566_v10 }
 0x131   : > { %2265 = vmatmul.mubr.msk.bf16.gmra.mrb[88].mxu1 %vm361_vm2, %v1423_v14 }
 0x154   : > { %v427_v17 = vpop.f32.mrb[0].mxu1  ;;  %v411_v19 = vpop.f32.mrb[0].mxu0 }
 0x155   : > { %v2062_v18 = vpop.f32.mrb[1].mxu1  ;;  %v2054_v21 = vpop.f32.mrb[1].mxu0 }
 0x156   : > { %v430_v7 = vpop.f32.mrb[2].mxu1  ;;  %v414_v4 = vpop.f32.mrb[2].mxu0 }
 0x157   : > { %v2063_v20 = vpop.f32.mrb[3].mxu1  ;;  %v2055_v22 = vpop.f32.mrb[3].mxu0 }
 0x15c   : > { %v435_v23 = vpop.f32.mrb[4].mxu1  ;;  %v419_v3 = vpop.f32.mrb[4].mxu0 }
 0x15d   : > { %v2066_v24 = vpop.f32.mrb[5].mxu1  ;;  %v2058_v16 = vpop.f32.mrb[5].mxu0 }
 0x15e   : > { %v438_v26 = vpop.f32.mrb[6].mxu1  ;;  %v422_v28 = vpop.f32.mrb[6].mxu0 }
 0x15f   : > { %v2067_v27 = vpop.f32.mrb[7].mxu1  ;;  %v2059_v0 = vpop.f32.mrb[7].mxu0 }
 0x164   : > { %v443_v29 = vpop.f32.mrb[8].mxu1 }
 0x165   : > { %v2070_v30 = vpop.f32.mrb[9].mxu1  ;;  %v653_v32 = vpop.f32.mrb[8].mxu0 }
 0x166   : > { %v446_v31 = vpop.f32.mrb[10].mxu1  ;;  %v2110_v33 = vpop.f32.mrb[9].mxu0 }
 0x167   : > { %v2071_v25 = vpop.f32.mrb[11].mxu1  ;;  %v656_v34 = vpop.f32.mrb[10].mxu0 }
 0x168   : > { %v2111_v35 = vpop.f32.mrb[11].mxu0 }
 0x16c   : > { %v519_v36 = vpop.f32.mrb[12].mxu1 }
 0x16d   : > { %v520_v37 = vadd.f32 %v519_v36, %v411_v19  ;;  %v2082_v38 = vpop.f32.mrb[13].mxu1 }
 0x16e   : > { %v522_v39 = vpop.f32.mrb[14].mxu1  ;;  %v661_v40 = vpop.f32.mrb[12].mxu0 }
 0x16f   : > { %v691_v41 = vadd.f32 %v653_v32, %v520_v37  ;;  %v523_v42 = vadd.f32 %v522_v39, %v414_v4  ;;  %v2083_v43 = vpop.f32.mrb[15].mxu1  ;;  %v2114_v44 = vpop.f32.mrb[13].mxu0 }
 0x170   : > { %v664_v45 = vpop.f32.mrb[14].mxu0 }
 0x171   : > { %v692_v46 = vadd.f32 %v656_v34, %v523_v42  ;;  %v2115_v47 = vpop.f32.mrb[15].mxu0 }
 0x174   : > { %v527_v48 = vpop.f32.mrb[16].mxu1 }
 0x175   : > { %v528_v49 = vadd.f32 %v527_v48, %v419_v3  ;;  %v2086_v50 = vpop.f32.mrb[17].mxu1 }
 0x176   : > { %v530_v51 = vpop.f32.mrb[18].mxu1  ;;  %v669_v52 = vpop.f32.mrb[16].mxu0 }
 0x177   : > { %v693_v53 = vadd.f32 %v661_v40, %v528_v49  ;;  %v531_v54 = vadd.f32 %v530_v51, %v422_v28  ;;  %v2087_v55 = vpop.f32.mrb[19].mxu1  ;;  %v2118_v56 = vpop.f32.mrb[17].mxu0 }
 0x178   : > { %v672_v57 = vpop.f32.mrb[18].mxu0 }
 0x179   : > { %v694_v58 = vadd.f32 %v664_v45, %v531_v54  ;;  %v2119_v59 = vpop.f32.mrb[19].mxu0 }
 0x17c   : > { %v535_v60 = vpop.f32.mrb[20].mxu1 }
 0x17d   : > { %v536_v61 = vadd.f32 %v535_v60, %v427_v17  ;;  %v2090_v62 = vpop.f32.mrb[21].mxu1 }
 0x17e   : > { %v538_v63 = vpop.f32.mrb[22].mxu1  ;;  %v677_v1 = vpop.f32.mrb[20].mxu0 }
 0x17f   : > { %v695_v5 = vadd.f32 %v669_v52, %v536_v61  ;;  %v539_v6 = vadd.f32 %v538_v63, %v430_v7  ;;  %v2091_v8 = vpop.f32.mrb[23].mxu1  ;;  %v2122_v9 = vpop.f32.mrb[21].mxu0 }
 0x180   : > { %v680_v10 = vpop.f32.mrb[22].mxu0 }
 0x181   : > { %v696_v11 = vadd.f32 %v672_v57, %v539_v6  ;;  %v2123_v12 = vpop.f32.mrb[23].mxu0 }
 0x184   : > { %v543_v13 = vpop.f32.mrb[24].mxu1 }
 0x185   : > { %v544_v2 = vadd.f32 %v543_v13, %v435_v23  ;;  %v2094_v14 = vpop.f32.mrb[25].mxu1 }
 0x186   : > { %v546_v15 = vpop.f32.mrb[26].mxu1  ;;  %v685_v18 = vpop.f32.mrb[24].mxu0 }
 0x187   : > { %v697_v19 = vadd.f32 %v677_v1, %v544_v2  ;;  %v547_v20 = vadd.f32 %v546_v15, %v438_v26  ;;  %v2095_v21 = vpop.f32.mrb[27].mxu1  ;;  %v2126_v4 = vpop.f32.mrb[25].mxu0 }
 0x188   : > { %v688_v17 = vpop.f32.mrb[26].mxu0 }
 0x189   : > { %v698_v22 = vadd.f32 %v680_v10, %v547_v20  ;;  %v2127_v24 = vpop.f32.mrb[27].mxu0 }
 0x18c   : > { %v551_v3 = vpop.f32.mrb[28].mxu1 }
 0x18d   : > { %v552_v27 = vadd.f32 %v551_v3, %v443_v29  ;;  %v2098_v7 = vpop.f32.mrb[29].mxu1 }
 0x18e   : > { %v554_v16 = vpop.f32.mrb[30].mxu1  ;;  %v1004_v28 = vpop.f32.mrb[28].mxu0 }
 0x18f   : > { %v699_v0 = vadd.f32 %v685_v18, %v552_v27  ;;  %v2099_v30 = vpop.f32.mrb[31].mxu1  ;;  %v2166_v31 = vpop.f32.mrb[29].mxu0 }
 0x190   : > { %v1007_v32 = vpop.f32.mrb[30].mxu0 }
 0x191   : > { %v2167_v23 = vpop.f32.mrb[31].mxu0 }
 0x194   : > { %v826_v25 = vpop.f32.mrb[32].mxu1 }
 0x195   : > { %v864_v33 = vadd.f32 %v826_v25, %v691_v41  ;;  %v2138_v34 = vpop.f32.mrb[33].mxu1 }
 0x196   : > { %v829_v35 = vpop.f32.mrb[34].mxu1  ;;  %v1012_v26 = vpop.f32.mrb[32].mxu0 }
 0x197   : > { %v1042_v36 = vadd.f32 %v1004_v28, %v864_v33  ;;  %v865_v37 = vadd.f32 %v829_v35, %v692_v46  ;;  %v2139_v38 = vpop.f32.mrb[35].mxu1  ;;  %v2170_v39 = vpop.f32.mrb[33].mxu0 }
 0x198   : > { %v1015_v40 = vpop.f32.mrb[34].mxu0 }
 0x199   : > { %v1043_v42 = vadd.f32 %v1007_v32, %v865_v37  ;;  %v2171_v29 = vpop.f32.mrb[35].mxu0 }
 0x19c   : > { %v834_v43 = vpop.f32.mrb[36].mxu1 }
 0x19d   : > { %v866_v44 = vadd.f32 %v834_v43, %v693_v53  ;;  %v2142_v45 = vpop.f32.mrb[37].mxu1 }
 0x19e   : > { %v837_v47 = vpop.f32.mrb[38].mxu1  ;;  %v1020_v48 = vpop.f32.mrb[36].mxu0 }
 0x19f   : > { %v1044_v49 = vadd.f32 %v1012_v26, %v866_v44  ;;  %v867_v50 = vadd.f32 %v837_v47, %v694_v58  ;;  %v2143_v51 = vpop.f32.mrb[39].mxu1  ;;  %v2174_v52 = vpop.f32.mrb[37].mxu0 }
 0x1a0   : > { %v1023_v41 = vpop.f32.mrb[38].mxu0 }
 0x1a1   : > { %v1045_v54 = vadd.f32 %v1015_v40, %v867_v50  ;;  %v2175_v55 = vpop.f32.mrb[39].mxu0 }
 0x1a4   : > { %v842_v56 = vpop.f32.mrb[40].mxu1 }
 0x1a5   : > { %v868_v57 = vadd.f32 %v842_v56, %v695_v5  ;;  %v2146_v46 = vpop.f32.mrb[41].mxu1 }
 0x1a6   : > { %v845_v59 = vpop.f32.mrb[42].mxu1  ;;  %v1028_v60 = vpop.f32.mrb[40].mxu0 }
 0x1a7   : > { %v1046_v61 = vadd.f32 %v1020_v48, %v868_v57  ;;  %v869_v62 = vadd.f32 %v845_v59, %v696_v11  ;;  %v2147_v63 = vpop.f32.mrb[43].mxu1  ;;  %v2178_v1 = vpop.f32.mrb[41].mxu0 }
 0x1a8   : > { %v1031_v53 = vpop.f32.mrb[42].mxu0 }
 0x1a9   : > { %v1047_v6 = vadd.f32 %v1023_v41, %v869_v62  ;;  %v2179_v8 = vpop.f32.mrb[43].mxu0 }
 0x1ac   : > { %v850_v9 = vpop.f32.mrb[44].mxu1 }
 0x1ad   : > { %v870_v10 = vadd.f32 %v850_v9, %v697_v19  ;;  %v2150_v58 = vpop.f32.mrb[45].mxu1 }
 0x1ae   : > { %v853_v12 = vpop.f32.mrb[46].mxu1  ;;  %v1036_v13 = vpop.f32.mrb[44].mxu0 }
 0x1af   : > { %v1048_v2 = vadd.f32 %v1028_v60, %v870_v10  ;;  %v871_v14 = vadd.f32 %v853_v12, %v698_v22  ;;  %v2151_v15 = vpop.f32.mrb[47].mxu1  ;;  %v2182_v18 = vpop.f32.mrb[45].mxu0 }
 0x1b0   : > { %v1039_v5 = vpop.f32.mrb[46].mxu0 }
 0x1b1   : > { %v1049_v20 = vadd.f32 %v1031_v53, %v871_v14  ;;  %v2183_v21 = vpop.f32.mrb[47].mxu0 }
 0x1b4   : > { %v858_v4 = vpop.f32.mrb[48].mxu1 }
 0x1b5   : > { %v872_v17 = vadd.f32 %v858_v4, %v699_v0  ;;  %v2154_v11 = vpop.f32.mrb[49].mxu1 }
 0x1b6   : > { %v861_v24 = vpop.f32.mrb[50].mxu1  ;;  %v1320_v3 = vpop.f32.mrb[48].mxu0 }
 0x1b7   : > { %v1050_v27 = vadd.f32 %v1036_v13, %v872_v17  ;;  %v2155_v7 = vpop.f32.mrb[51].mxu1  ;;  %v2222_v16 = vpop.f32.mrb[49].mxu0 }
 0x1b8   : > { %v1323_v28 = vpop.f32.mrb[50].mxu0 }
 0x1b9   : > { %v2223_v19 = vpop.f32.mrb[51].mxu0 }
 0x1bc   : > { %v1147_v30 = vpop.f32.mrb[52].mxu1 }
 0x1bd   : > { %v1185_v31 = vadd.f32 %v1147_v30, %v1042_v36  ;;  %v2194_v32 = vpop.f32.mrb[53].mxu1 }
 0x1be   : > { %v1150_v23 = vpop.f32.mrb[54].mxu1  ;;  %v1328_v22 = vpop.f32.mrb[52].mxu0 }
 0x1bf   : > { %v1358_v25 = vadd.f32 %v1320_v3, %v1185_v31  ;;  %v1186_v33 = vadd.f32 %v1150_v23, %v1043_v42  ;;  %v2195_v34 = vpop.f32.mrb[55].mxu1  ;;  %v2226_v35 = vpop.f32.mrb[53].mxu0 }
 0x1c0   : > { %v1331_v26 = vpop.f32.mrb[54].mxu0 }
 0x1c1   : > { %v1359_v37 = vadd.f32 %v1323_v28, %v1186_v33  ;;  %v2227_v0 = vpop.f32.mrb[55].mxu0  ;;  %v3198_v28 = vld [vmem:[#allocation7] ss:$0 sm:$0xff] }
 0x1c4   : > { %v1155_v38 = vpop.f32.mrb[56].mxu1 }
 0x1c5   : > { %v1187_v39 = vadd.f32 %v1155_v38, %v1044_v49  ;;  %v2198_v40 = vpop.f32.mrb[57].mxu1 }
 0x1c6   : > { %v1158_v29 = vpop.f32.mrb[58].mxu1  ;;  %v1336_v43 = vpop.f32.mrb[56].mxu0 }
 0x1c7   : > { %v1360_v44 = vadd.f32 %v1328_v22, %v1187_v39  ;;  %v1188_v45 = vadd.f32 %v1158_v29, %v1045_v54  ;;  %v2199_v47 = vpop.f32.mrb[59].mxu1  ;;  %v2230_v48 = vpop.f32.mrb[57].mxu0 }
 0x1c8   : > { %v1339_v36 = vpop.f32.mrb[58].mxu0 }
 0x1c9   : > { %v3185_v50 = vadd.f32 %v1331_v26, %v1188_v45  ;;  %v2231_v51 = vpop.f32.mrb[59].mxu0 }
 0x1cc   : > { %v1163_v52 = vpop.f32.mrb[60].mxu1 }
 0x1cd   : > { %v1189_v42 = vadd.f32 %v1163_v52, %v1046_v61  ;;  %v2202_v41 = vpop.f32.mrb[61].mxu1 }
 0x1ce   : > { %v1166_v55 = vpop.f32.mrb[62].mxu1  ;;  %v1344_v56 = vpop.f32.mrb[60].mxu0 }
 0x1cf   : > { %v3187_v57 = vadd.f32 %v1336_v43, %v1189_v42  ;;  %v1190_v46 = vadd.f32 %v1166_v55, %v1047_v6  ;;  %v2203_v49 = vpop.f32.mrb[63].mxu1  ;;  %v2234_v59 = vpop.f32.mrb[61].mxu0 }
 0x1d0   : > { %v1347_v60 = vpop.f32.mrb[62].mxu0 }
 0x1d1   : > { %v3189_v62 = vadd.f32 %v1339_v36, %v1190_v46  ;;  %v2235_v54 = vpop.f32.mrb[63].mxu0 }
 0x1d4   : > { %v1171_v63 = vpop.f32.mrb[64].mxu1 }
 0x1d5   : > { %v1191_v1 = vadd.f32 %v1171_v63, %v1048_v2  ;;  %v2206_v53 = vpop.f32.mrb[65].mxu1 }
 0x1d6   : > { %v1174_v8 = vpop.f32.mrb[66].mxu1  ;;  %v1352_v9 = vpop.f32.mrb[64].mxu0 }
 0x1d7   : > { %v3191_v10 = vadd.f32 %v1344_v56, %v1191_v1  ;;  %v1192_v61 = vadd.f32 %v1174_v8, %v1049_v20  ;;  %v2207_v58 = vpop.f32.mrb[67].mxu1  ;;  %v2238_v12 = vpop.f32.mrb[65].mxu0 }
 0x1d8   : > { %v1355_v13 = vpop.f32.mrb[66].mxu0 }
 0x1d9   : > { %v3193_v14 = vadd.f32 %v1347_v60, %v1192_v61  ;;  %v2239_v6 = vpop.f32.mrb[67].mxu0 }
 0x1dc   : > { %v1179_v15 = vpop.f32.mrb[68].mxu1 }
 0x1dd   : > { %v1193_v18 = vadd.f32 %v1179_v15, %v1050_v27  ;;  %v2210_v5 = vpop.f32.mrb[69].mxu1 }
 0x1de   : > { %v1182_v21 = vpop.f32.mrb[70].mxu1  ;;  %v1641_v4 = vpop.f32.mrb[68].mxu0 }
 0x1df   : > { %v3195_v17 = vadd.f32 %v1352_v9, %v1193_v18  ;;  %v2211_v2 = vpop.f32.mrb[71].mxu1  ;;  %v2278_v11 = vpop.f32.mrb[69].mxu0 }
 0x1e0   : > { %v1644_v24 = vpop.f32.mrb[70].mxu0 }
 0x1e1   : > { %v2279_v3 = vpop.f32.mrb[71].mxu0 }
 0x1e4   : > { %v1498_v7 = vpop.f32.mrb[72].mxu1 }
 0x1e5   : > { %v1536_v20 = vadd.f32 %v1498_v7, %v1358_v25  ;;  %v2250_v16 = vpop.f32.mrb[73].mxu1 }
 0x1e6   : > { %v1501_v19 = vpop.f32.mrb[74].mxu1  ;;  %v1649_v30 = vpop.f32.mrb[72].mxu0 }
 0x1e7   : > { %v1679_v31 = vadd.f32 %v1641_v4, %v1536_v20  ;;  %v1537_v32 = vadd.f32 %v1501_v19, %v1359_v37  ;;  %v2251_v27 = vpop.f32.mrb[75].mxu1  ;;  %v2282_v23 = vpop.f32.mrb[73].mxu0 }
 0x1e8   : > { %v1652_v22 = vpop.f32.mrb[74].mxu0 }
 0x1e9   : > { %v1695_v33 = vadd.f32 %v3198_v28, %v1679_v31  ;;  %v1680_v34 = vadd.f32 %v1644_v24, %v1537_v32  ;;  %v2283_v35 = vpop.f32.mrb[75].mxu0 }
 0x1eb   : > { %v1704_v26 = vmax.f32 %v1695_v33, 0.0  ;;  %v1696_v0 = vadd.f32 %v3198_v28, %v1680_v34 }
 0x1ec   : > { %v1506_v38 = vpop.f32.mrb[76].mxu1 }
 0x1ed   : > { %1713 = vst.msk [vmem:[%s3202_s22] sm:$0xff] %vm361_vm2, %v1704_v26  ;;  %v1705_v25 = vmax.f32 %v1696_v0, 0.0  ;;  %v1538_v39 = vadd.f32 %v1506_v38, %v1360_v44  ;;  %v2254_v37 = vpop.f32.mrb[77].mxu1 }
 0x1ee   : > { %v1509_v40 = vpop.f32.mrb[78].mxu1  ;;  %v1657_v29 = vpop.f32.mrb[76].mxu0 }
 0x1ef   : > { %1714 = vst.msk [vmem:[%s3202_s22 + $0x8] sm:$0xff] %vm361_vm2, %v1705_v25  ;;  %v1681_v43 = vadd.f32 %v1649_v30, %v1538_v39  ;;  %v1539_v45 = vadd.f32 %v1509_v40, %v3185_v50  ;;  %v2255_v47 = vpop.f32.mrb[79].mxu1  ;;  %v2286_v48 = vpop.f32.mrb[77].mxu0 }
 0x1f0   : > { %v1660_v36 = vpop.f32.mrb[78].mxu0 }
 0x1f1   : > { %v1697_v51 = vadd.f32 %v3198_v28, %v1681_v43  ;;  %v1682_v52 = vadd.f32 %v1652_v22, %v1539_v45  ;;  %v2287_v42 = vpop.f32.mrb[79].mxu0 }
 0x1f3   : > { %v1706_v41 = vmax.f32 %v1697_v51, 0.0  ;;  %v1698_v44 = vadd.f32 %v3198_v28, %v1682_v52 }
 0x1f4   : > { %v1514_v55 = vpop.f32.mrb[80].mxu1 }
 0x1f5   : > { %1715 = vst.msk [vmem:[%s3202_s22 + $0x10] sm:$0xff] %vm361_vm2, %v1706_v41  ;;  %v1707_v56 = vmax.f32 %v1698_v44, 0.0  ;;  %v1540_v46 = vadd.f32 %v1514_v55, %v3187_v57  ;;  %v2258_v49 = vpop.f32.mrb[81].mxu1 }
 0x1f6   : > { %v1517_v50 = vpop.f32.mrb[82].mxu1  ;;  %v1665_v59 = vpop.f32.mrb[80].mxu0 }
 0x1f7   : > { %1716 = vst.msk [vmem:[%s3202_s22 + $0x18] sm:$0xff] %vm361_vm2, %v1707_v56  ;;  %v1683_v60 = vadd.f32 %v1657_v29, %v1540_v46  ;;  %v1541_v54 = vadd.f32 %v1517_v50, %v3189_v62  ;;  %v2259_v63 = vpop.f32.mrb[83].mxu1  ;;  %v2290_v1 = vpop.f32.mrb[81].mxu0 }
 0x1f8   : > { %v1668_v53 = vpop.f32.mrb[82].mxu0 }
 0x1f9   : > { %v1699_v8 = vadd.f32 %v3198_v28, %v1683_v60  ;;  %v1684_v9 = vadd.f32 %v1660_v36, %v1541_v54  ;;  %v2291_v61 = vpop.f32.mrb[83].mxu0 }
 0x1fb   : > { %v1708_v58 = vmax.f32 %v1699_v8, 0.0  ;;  %v1700_v57 = vadd.f32 %v3198_v28, %v1684_v9 }
 0x1fc   : > { %v1522_v12 = vpop.f32.mrb[84].mxu1 }
 0x1fd   : > { %1717 = vst.msk [vmem:[%s3202_s22 + $0x20] sm:$0xff] %vm361_vm2, %v1708_v58  ;;  %v1709_v13 = vmax.f32 %v1700_v57, 0.0  ;;  %v1542_v6 = vadd.f32 %v1522_v12, %v3191_v10  ;;  %v2262_v15 = vpop.f32.mrb[85].mxu1 }
 0x1fe   : > { %v1525_v62 = vpop.f32.mrb[86].mxu1  ;;  %v1673_v18 = vpop.f32.mrb[84].mxu0 }
 0x1ff   : > { %1718 = vst.msk [vmem:[%s3202_s22 + $0x28] sm:$0xff] %vm361_vm2, %v1709_v13  ;;  %v1685_v5 = vadd.f32 %v1665_v59, %v1542_v6  ;;  %v1543_v21 = vadd.f32 %v1525_v62, %v3193_v14  ;;  %v2263_v4 = vpop.f32.mrb[87].mxu1  ;;  %v2294_v2 = vpop.f32.mrb[85].mxu0 }
 0x200   : > { %v1676_v11 = vpop.f32.mrb[86].mxu0 }
 0x201   : > { %v1701_v24 = vadd.f32 %v3198_v28, %v1685_v5  ;;  %v1686_v3 = vadd.f32 %v1668_v53, %v1543_v21  ;;  %v2295_v7 = vpop.f32.mrb[87].mxu0 }
 0x203   : > { %v1710_v10 = vmax.f32 %v1701_v24, 0.0  ;;  %v1702_v20 = vadd.f32 %v3198_v28, %v1686_v3 }
 0x204   : > { %v1530_v16 = vpop.f32.mrb[88].mxu1 }
 0x205   : > { %1719 = vst.msk [vmem:[%s3202_s22 + $0x30] sm:$0xff] %vm361_vm2, %v1710_v10  ;;  %v1711_v19 = vmax.f32 %v1702_v20, 0.0  ;;  %v1544_v14 = vadd.f32 %v1530_v16, %v3195_v17  ;;  %v2266_v30 = vpop.f32.mrb[89].mxu1 }
 0x206   : > { %v1533_v31 = vpop.f32.mrb[90].mxu1 }
 0x207   : > { %1720 = vst.msk [vmem:[%s3202_s22 + $0x38] sm:$0xff] %vm361_vm2, %v1711_v19  ;;  %v1687_v32 = vadd.f32 %v1673_v18, %v1544_v14  ;;  %v2267_v27 = vpop.f32.mrb[91].mxu1 }
 0x209   : > { %v1703_v23 = vadd.f32 %v3198_v28, %v1687_v32 }
 0x20b   : > { %v1712_v17 = vmax.f32 %v1703_v23, 0.0 }
 0x20d   : > { %1721 = vst.msk [vmem:[%s3202_s22 + $0x40] sm:$0xff] %vm361_vm2, %v1712_v17 }
 0x20e   : > { %2551 = shalt.err (!%p2548_p5)
}
 0x20f   : > { %s2552_s30 = scalar_lea.hbm %s3238_s9, 1152  ;;  %s2556_s7 = scalar_lea.hbm %s3293_s3, 9216 }
 0x210   : > { %p2553_p9 = scmp.ne.s32.totalorder %s3238_s9, %s2552_s30  ;;  %p2557_p3 = scmp.lt.u32.totalorder %s3238_s9, %s3293_s3 }
 0x211   : > { %p2558_p7 = scmp.lt.u32.totalorder %s2556_s7, %s2552_s30  ;;  %p2560_p2 = scmp.lt.u32.totalorder %s2552_s30, %s3238_s9 }
 0x212   : > { %p2554_p12 = pnand %p2553_p9, %p2785_p11 }
 0x213   : > { %p2559_p10 = por %p2558_p7, %p2557_p3 }
 0x214   : > { %p2555_p1 = pneg %p2554_p12 }
 0x215   : > { %p2561_p4 = por %p2560_p2, %p2559_p10 }
 0x217   : > { %p2562_p6 = pnand %p2561_p4, %p2555_p1 }
 0x219   : > { %2565 = shalt.err (!%p2562_p6)
}
 0x21a   : > { %s2634_s22 = smov 128   ;;  %s2635_s24 = smov 8  }
 0x21b   : > { %2316 = dma.vmem_to_hbm [thread:$0]  (%p2785_p11), %s3240_s11, 1152, %s3238_s9, %s1723_s15, %s2634_s22, %s2634_s22, %s2635_s24  }
 0x21c PF: > { %p2338_p8 = scmp.ge.s32.totalorder %s2624_s17, 2  ;;  %s1752_s18 = sand.u32 1, %s2604_s12  }
 0x21d   : > { %p3310_p13 = scmp.ne.s32.totalorder %s3301_s23, 0  ;;  %s1753_s26 = scalar_lea.sflag [#allocation4], %s1752_s18 }
 0x21f   : > { %p2330_p0 = pnand %p2338_p8, %p3310_p13 }
 0x221   : > { %2599 = dma.done.wait (!%p2330_p0), %s1753_s26, 1152  }
 0x222   : > { %2601 = vsyncadd (!%p2330_p0), %s1753_s26, 4294966144  ;;  %s20_s17 = sadd.s32 1, %s2624_s17   ;;  %s3311_s12 = smov %s2608_s13 }
 0x223   : > { %p17_p5 = scmp.ge.s32.totalorder %s20_s17, 10   ;;  %s3312_s13 = smov %s2612_s14 }
 0x224   : > { %s3313_s14 = smov %s2794_s6  ;;  %s3314_s15 = smov %s2620_s16 }
 0x225   : > { %s3315_s16 = smov %s3317_s25  ;;  %19 = sbr.rel (!%p17_p5) target bundleno = 7 (0x7), region = 95 }
 0x22c   :  { %1758 = vsyncpa [#allocation3], 1 }
 0x22d   :  { %1760 = vsyncpa [#allocation3 + $0x1], 1 }
 0x22e   :  { %1761 = vsyncpa [#allocation6], 1 }
 0x22f   :  { %1762 = vsyncpa [#allocation4], 1 }
 0x230   :  { %1764 = vsyncpa [#allocation4 + $0x1], 1 }

</bundles_post_ra>
